<compile_context>
chip_gen: v7x
topology: tpu7x:2x2x1
jax: 0.10.0
libtpu: 0.0.40
codegen_flags: <defaults>
</compile_context>

<pallas_src>
import functools

import jax
import jax.numpy as jnp
from jax.experimental import pallas as pl
from jax.experimental.pallas import tpu as pltpu


def _round_up(x, m):
    return (x + m - 1) // m * m


def _vmem_limit(estimate_bytes):
    """Explicit scoped-VMEM request: estimate + headroom, capped at v7x physical."""
    return int(min(estimate_bytes + (8 << 20), 64 << 20))


# ----------------------------------------------------------------------------
# Pallas kernels
# ----------------------------------------------------------------------------

def _matmul_bias_kernel(x_ref, w_ref, b_ref, o_ref, acc_ref, *, relu):
    """o = x @ w + b (optional ReLU).  K-tiled (last grid axis, 'arbitrary')
    with an f32 VMEM accumulator; bf16 inputs, f32 MXU accumulation."""
    kk = pl.program_id(2)

    @pl.when(kk == 0)
    def _():
        acc_ref[...] = jnp.zeros_like(acc_ref)

    acc_ref[...] += jnp.dot(x_ref[...], w_ref[...],
                            preferred_element_type=jnp.float32)

    @pl.when(kk == pl.num_programs(2) - 1)
    def _():
        y = acc_ref[...] + b_ref[...]
        if relu:
            y = jnp.maximum(y, 0.0)
        o_ref[...] = y.astype(o_ref.dtype)


def matmul_bias(x, w, b, *, relu=False, out_dtype=jnp.float32,
                tm=512, tn=512, tk=512):
    """Tiled (M, N, K) matmul + bias.  Lane-dense N tiles, sublane-aligned M,
    K-tiled so VMEM stays bounded for any K.  Padding / final slice are
    skipped entirely when the shapes are already aligned."""
    m, k = x.shape
    k2, n = w.shape
    assert k == k2

    mp = _round_up(m, 8)
    tm = min(tm, mp)
    mp = _round_up(mp, tm)
    np_ = _round_up(n, 128)
    tn = min(tn, np_)
    np_ = _round_up(np_, tn)
    kp = _round_up(k, 128)
    tk = min(tk, kp)
    kp = _round_up(kp, tk)

    xb = x.astype(jnp.bfloat16)
    wb = w.astype(jnp.bfloat16)
    bv = b.astype(jnp.float32).reshape(1, -1)
    if mp != m or kp != k:
        xb = jnp.pad(xb, ((0, mp - m), (0, kp - k)))
    if kp != k or np_ != n:
        wb = jnp.pad(wb, ((0, kp - k), (0, np_ - n)))
    if np_ != n:
        bv = jnp.pad(bv, ((0, 0), (0, np_ - n)))

    out_bytes = 2 if out_dtype == jnp.bfloat16 else 4
    vmem_est = (2 * tm * tk * 2 + 2 * tk * tn * 2 + 2 * tn * 4
                + tm * tn * 4 + 2 * tm * tn * out_bytes)

    out = pl.pallas_call(
        functools.partial(_matmul_bias_kernel, relu=relu),
        out_shape=jax.ShapeDtypeStruct((mp, np_), out_dtype),
        grid_spec=pltpu.PrefetchScalarGridSpec(
            num_scalar_prefetch=0,
            grid=(mp // tm, np_ // tn, kp // tk),
            in_specs=[
                pl.BlockSpec((tm, tk), lambda i, j, kk: (i, kk)),
                pl.BlockSpec((tk, tn), lambda i, j, kk: (kk, j)),
                pl.BlockSpec((1, tn), lambda i, j, kk: (0, j)),
            ],
            out_specs=pl.BlockSpec((tm, tn), lambda i, j, kk: (i, j)),
            scratch_shapes=[pltpu.VMEM((tm, tn), jnp.float32)],
        ),
        compiler_params=pltpu.CompilerParams(
            dimension_semantics=("parallel", "parallel", "arbitrary"),
            vmem_limit_bytes=_vmem_limit(vmem_est)),
    )(xb, wb, bv)
    if mp != m or np_ != n:
        out = out[:m, :n]
    return out


def _conv_pool_kernel(p_ref, w_ref, b_ref, o_ref, acc_ref, *, inv_hw):
    """Fused conv-as-matmul + ReLU + global average pool.

    Grid = (batch_blocks, spatial_tiles); spatial is the reduction axis.  The
    running per-image sums live in a (bb, 8, F) VMEM accumulator updated with
    pure vreg adds in the hot loop; the single cross-sublane 8->1 collapse
    happens once in the epilogue.  Only (bb, F) pooled rows hit HBM."""
    s = pl.program_id(1)

    @pl.when(s == 0)
    def _():
        acc_ref[...] = jnp.zeros_like(acc_ref)

    bb, ts, k = p_ref.shape
    f = w_ref.shape[1]
    y = jnp.dot(p_ref[...].reshape(bb * ts, k), w_ref[...],
                preferred_element_type=jnp.float32)
    y = jnp.maximum(y + b_ref[...], 0.0)
    acc_ref[...] += y.reshape(bb, ts // 8, 8, f).sum(axis=1)

    @pl.when(s == pl.num_programs(1) - 1)
    def _():
        o_ref[...] = (acc_ref[...].sum(axis=1) * inv_hw).astype(o_ref.dtype)


def conv_relu_pool(patches_bsk, conv_w, conv_b):
    """patches_bsk: (B, H*W, Kpad) bf16 im2col patches (K zero-padded).
    Returns (B, F) = mean over spatial of relu(patch @ conv_w + conv_b)."""
    B, HW, K = patches_bsk.shape
    F = conv_w.shape[1]
    assert HW % 8 == 0, "H*W must be a multiple of 8"

    bb = 8                                  # images per block (sublane-aligned out)
    Bp = _round_up(B, bb)
    if Bp != B:
        patches_bsk = jnp.pad(patches_bsk, ((0, Bp - B), (0, 0), (0, 0)))

    # Largest spatial tile whose bf16 patch block fits comfortably in VMEM.
    ts = 8
    for cand in (HW, 4096, 2048, 1024, 512, 256, 128, 64, 32, 16, 8):
        if cand <= HW and HW % cand == 0 and bb * cand * K * 2 <= (8 << 20):
            ts = cand
            break

    vmem_est = (2 * bb * ts * K * 2 + K * F * 2 + F * 4
                + 2 * bb * F * 4 + bb * 8 * F * 4)
    out = pl.pallas_call(
        functools.partial(_conv_pool_kernel, inv_hw=1.0 / HW),
        out_shape=jax.ShapeDtypeStruct((Bp, F), jnp.float32),
        grid_spec=pltpu.PrefetchScalarGridSpec(
            num_scalar_prefetch=0,
            grid=(Bp // bb, HW // ts),
            in_specs=[
                pl.BlockSpec((bb, ts, K), lambda b, s: (b, s, 0)),
                # grid-invariant weights: single-buffered (VMEM hygiene, v7x)
                pl.BlockSpec((K, F), lambda b, s: (0, 0),
                             pipeline_mode=pl.Buffered(1)),
                pl.BlockSpec((1, F), lambda b, s: (0, 0),
                             pipeline_mode=pl.Buffered(1)),
            ],
            out_specs=pl.BlockSpec((bb, F), lambda b, s: (b, 0)),
            scratch_shapes=[pltpu.VMEM((bb, 8, F), jnp.float32)],
        ),
        compiler_params=pltpu.CompilerParams(
            dimension_semantics=("parallel", "arbitrary"),
            vmem_limit_bytes=_vmem_limit(vmem_est)),
    )(patches_bsk, conv_w, conv_b.astype(jnp.float32).reshape(1, -1))
    return out[:B] if Bp != B else out


def _embed_bn_kernel(x_ref, w_ref, b_ref, o_ref, *, eps):
    """y = BatchNorm1d(x @ w + b) with batch statistics, gamma=1, beta=0."""
    y = jnp.dot(x_ref[...], w_ref[...], preferred_element_type=jnp.float32)
    y = y + b_ref[...]
    mean = jnp.mean(y, axis=0, keepdims=True)
    var = jnp.mean((y - mean) ** 2, axis=0, keepdims=True)   # biased, like torch
    o_ref[...] = ((y - mean) * jax.lax.rsqrt(var + eps)).astype(o_ref.dtype)


def embed_batchnorm(x, w, b, *, eps=1e-5):
    m, k = x.shape
    n = w.shape[1]
    vmem_est = 2 * (m * k * 2 + k * n * 2 + n * 4 + m * n * 4)
    return pl.pallas_call(
        functools.partial(_embed_bn_kernel, eps=eps),
        out_shape=jax.ShapeDtypeStruct((m, n), jnp.float32),
        compiler_params=pltpu.CompilerParams(
            vmem_limit_bytes=_vmem_limit(vmem_est)),
    )(x.astype(jnp.bfloat16), w.astype(jnp.bfloat16),
      b.astype(jnp.float32).reshape(1, -1))


def _lstm_kernel(gx_ref, whh_ref, h_out_ref, h_scr, c_scr, *, tc):
    """Tc LSTM timesteps per grid iteration.  Input-to-hidden gate
    pre-activations (x @ w_ih + b, bf16) were hoisted out and arrive per
    chunk in gx_ref; only the small h @ w_hh matmul and the f32 pointwise
    gate math run inside the recurrence."""
    t = pl.program_id(1)
    hid = whh_ref.shape[0]

    @pl.when(t == 0)
    def _():
        h_scr[...] = jnp.zeros_like(h_scr)
        c_scr[...] = jnp.zeros_like(c_scr)

    def step(i, carry):
        h, c = carry                                             # h bf16, c f32
        gates = gx_ref[i].astype(jnp.float32) + jnp.dot(
            h, whh_ref[...], preferred_element_type=jnp.float32)  # (Bb, 4H) f32
        ig = jax.nn.sigmoid(gates[:, 0 * hid:1 * hid])
        fg = jax.nn.sigmoid(gates[:, 1 * hid:2 * hid])
        gg = jnp.tanh(gates[:, 2 * hid:3 * hid])
        og = jax.nn.sigmoid(gates[:, 3 * hid:4 * hid])
        c = fg * c + ig * gg
        h = (og * jnp.tanh(c)).astype(jnp.bfloat16)
        h_out_ref[i] = h
        return h, c

    h, c = jax.lax.fori_loop(0, tc, step, (h_scr[...], c_scr[...]),
                             unroll=True)
    h_scr[...] = h
    c_scr[...] = c


def lstm_forward(gates_x_tbg, w_hh):
    """gates_x_tbg: (T, B, 4H) bf16 precomputed x@w_ih + b, time-major.
    Returns (T, B, H) hidden states (bf16)."""
    T, B, G = gates_x_tbg.shape
    H = w_hh.shape[0]
    assert G == 4 * H
    # Gate slices stay relayout-free only when H is a multiple of 128 lanes.
    assert H % 128 == 0, "hidden_size must be a multiple of 128"

    # v7x megacore: give the second TensorCore an independent batch block
    # (the time axis must stay 'arbitrary').  No-op on v5e/v6e (1 TC).
    nb = 2 if B % 16 == 0 else 1
    bb = B // nb

    # Timestep chunk: amortize the ~0.35us per-grid-step pipeline overhead.
    tc = 1
    for cand in (8, 4, 2, 1):
        if T % cand == 0:
            tc = cand
            break

    vmem_est = (2 * tc * bb * G * 2 + H * G * 2
                + 2 * tc * bb * H * 2 + bb * H * (2 + 4))
    return pl.pallas_call(
        functools.partial(_lstm_kernel, tc=tc),
        out_shape=jax.ShapeDtypeStruct((T, B, H), jnp.bfloat16),
        grid_spec=pltpu.PrefetchScalarGridSpec(
            num_scalar_prefetch=0,
            grid=(nb, T // tc),
            in_specs=[
                pl.BlockSpec((tc, bb, G), lambda b, t: (t, b, 0)),
                # grid-invariant recurrent weights: single-buffered
                pl.BlockSpec((H, G), lambda b, t: (0, 0),
                             pipeline_mode=pl.Buffered(1)),
            ],
            out_specs=pl.BlockSpec((tc, bb, H), lambda b, t: (t, b, 0)),
            scratch_shapes=[
                pltpu.VMEM((bb, H), jnp.bfloat16),   # h carry (matmul input dtype)
                pltpu.VMEM((bb, H), jnp.float32),    # c carry (kept f32)
            ],
        ),
        compiler_params=pltpu.CompilerParams(
            dimension_semantics=("parallel", "arbitrary"),
            vmem_limit_bytes=_vmem_limit(vmem_est)),
    )(gates_x_tbg.astype(jnp.bfloat16), w_hh.astype(jnp.bfloat16))


# ----------------------------------------------------------------------------
# Model glue (plain JAX)
# ----------------------------------------------------------------------------

def im2col_3x3(x_nhwc):
    """3x3, stride 1, pad 1 patches -> (B, H, W, 9*C)."""
    b, h, w, c = x_nhwc.shape
    xp = jnp.pad(x_nhwc, ((0, 0), (1, 1), (1, 1), (0, 0)))
    cols = []
    for dy in range(3):
        for dx in range(3):
            cols.append(xp[:, dy:dy + h, dx:dx + w, :])
    return jnp.concatenate(cols, axis=-1)


def init_params(key, *, in_ch, feat_dim, embedding_size, hidden_size, vocab_size):
    ks = jax.random.split(key, 8)
    scale = 0.05

    def w(k, shape):  # bf16 weights, f32 MXU accumulation at use sites
        return (scale * jax.random.normal(k, shape, jnp.float32)).astype(jnp.bfloat16)

    p = {
        # encoder (conv stand-in for resnext + embed linear; BN has gamma=1, beta=0)
        "conv_w": w(ks[0], (9 * in_ch, feat_dim)),
        "conv_b": jnp.zeros((feat_dim,), jnp.float32),
        "embed_w": w(ks[1], (feat_dim, embedding_size)),
        "embed_b": scale * jax.random.normal(ks[2], (embedding_size,), jnp.float32),
        # decoder
        "tok_embed": w(ks[3], (vocab_size, embedding_size)),
        "w_ih": w(ks[4], (embedding_size, 4 * hidden_size)),
        "w_hh": w(ks[5], (hidden_size, 4 * hidden_size)),
        "lstm_b": scale * jax.random.normal(ks[6], (4 * hidden_size,), jnp.float32),
        "out_w": w(ks[7], (hidden_size, vocab_size)),
        "out_b": jnp.zeros((vocab_size,), jnp.float32),
    }
    return p


def seq2seq_forward(params, images_nchw, captions, lengths):
    """images: (B, C, Hs, Ws) NCHW; captions: (B, Lc) int32;
    lengths: python list, sorted descending (pack_padded_sequence contract).
    Returns (sum(lengths), vocab_size) — same as the PyTorch module."""
    B = images_nchw.shape[0]

    # ---------------- Encoder ----------------
    x_nhwc = jnp.transpose(images_nchw, (0, 2, 3, 1))            # NCHW -> NHWC
    patches = im2col_3x3(x_nhwc)                                 # (B, H, W, 9C)
    _, hh, ww, pc = patches.shape
    kpad = _round_up(pc, 32)                                     # align K lanes
    patches = patches.reshape(B, hh * ww, pc)
    if kpad != pc:
        patches = jnp.pad(patches, ((0, 0), (0, 0), (0, kpad - pc)))
    patches = patches.astype(jnp.bfloat16)
    conv_w = params["conv_w"]
    if kpad != pc:
        conv_w = jnp.pad(conv_w, ((0, kpad - pc), (0, 0)))

    # fused conv-matmul + ReLU + global average pool -> (B, F)
    pooled = conv_relu_pool(patches, conv_w, params["conv_b"])

    # Linear embed (+Dropout=identity) + BatchNorm1d (batch stats, gamma=1, beta=0)
    features = embed_batchnorm(pooled, params["embed_w"], params["embed_b"])

    # ---------------- Decoder ----------------
    tok_emb = jnp.take(params["tok_embed"], captions, axis=0)    # (B, Lc, E) bf16
    seq = jnp.concatenate(
        [features.astype(jnp.bfloat16)[:, None, :], tok_emb], axis=1)  # (B, T, E)
    T, E = seq.shape[1], seq.shape[2]
    x_tbe = jnp.transpose(seq, (1, 0, 2))                        # time-major

    # Hoisted input-to-hidden matmul: one big, well-shaped MXU matmul.
    # Emitted in bf16 (f32 accumulation in-kernel) to halve the recurrent DMA.
    H = params["w_hh"].shape[0]
    gates_x = matmul_bias(x_tbe.reshape(T * B, E), params["w_ih"],
                          params["lstm_b"], out_dtype=jnp.bfloat16)  # (T*B, 4H)
    gates_x = gates_x.reshape(T, B, 4 * H)

    hiddens = lstm_forward(gates_x, params["w_hh"])              # (T, B, H) bf16

    # Dense logits over all T*B rows (keeps the matmul lane/sublane aligned),
    # then pack_padded_sequence row selection (t-major, batch sorted desc).
    logits = matmul_bias(hiddens.reshape(T * B, H),
                         params["out_w"], params["out_b"])       # (T*B, V) f32
    flat_idx = []
    for t in range(T):
        for b in range(B):
            if t < lengths[b]:
                flat_idx.append(t * B + b)
    outputs = jnp.take(logits, jnp.array(flat_idx, dtype=jnp.int32), axis=0)
    return outputs


# ----------------------------------------------------------------------------
# Demo
# ----------------------------------------------------------------------------

if __name__ == "__main__":
    key = jax.random.PRNGKey(0)
    k_img, k_cap, k_par = jax.random.split(key, 3)

    B, C, HS, WS = 8, 3, 16, 16
    embedding_size, hidden_size, vocab_size = 128, 128, 256
    feat_dim = 128
    Lc = 7                                       # caption tokens; T = 1 + Lc = 8
    lengths = [8, 8, 7, 6, 5, 4, 3, 2]           # sorted descending, <= T

    images = jax.random.normal(k_img, (B, C, HS, WS), jnp.float32)
    captions = jax.random.randint(k_cap, (B, Lc), 0, vocab_size, jnp.int32)

    params = init_params(k_par, in_ch=C, feat_dim=feat_dim,
                         embedding_size=embedding_size,
                         hidden_size=hidden_size, vocab_size=vocab_size)

    out = seq2seq_forward(params, images, captions, lengths)
    out = jax.block_until_ready(out)
    assert out.shape == (sum(lengths), vocab_size), out.shape
    assert jnp.all(jnp.isfinite(out))
    print("KERNEL_OK")
</pallas_src>

<mosaic_0001>
module attributes {stable_mosaic.version = 11 : i64} {
  func.func @_conv_pool_kernel(%arg0: i32, %arg1: i32, %arg2: memref<8x256x32xbf16, #tpu.memory_space<vmem>>, %arg3: memref<32x128xbf16, #tpu.memory_space<vmem>>, %arg4: memref<1x128xf32, #tpu.memory_space<vmem>>, %arg5: memref<8x128xf32, #tpu.memory_space<vmem>>, %arg6: memref<8x8x128xf32, #tpu.memory_space<vmem>>) attributes {dimension_semantics = [#tpu.dimension_semantics<parallel>, #tpu.dimension_semantics<arbitrary>], iteration_bounds = array<i64: 1, 1>, scalar_prefetch = 0 : i64, scratch_operands = 1 : i64, tpu.core_type = #tpu.core_type<tc>, window_params = [{transform_indices = @transform_0, window_bounds = array<i64: 8, 256, 32>}, {pipeline_mode = #tpu.pipeline_mode<synchronous>, transform_indices = @transform_1, window_bounds = array<i64: 32, 128>}, {pipeline_mode = #tpu.pipeline_mode<synchronous>, transform_indices = @transform_2, window_bounds = array<i64: 1, 128>}, {transform_indices = @transform_3, window_bounds = array<i64: 8, 128>}]} {
    %c0_i32 = arith.constant 0 : i32
    %0 = arith.cmpi eq, %arg1, %c0_i32 : i32
    %1 = arith.extui %0 : i1 to i32
    %c0_i32_0 = arith.constant 0 : i32
    %2 = arith.cmpi ne, %1, %c0_i32_0 : i32
    scf.if %2 {
      %cst_17 = arith.constant 0.000000e+00 : f32
      %20 = vector.broadcast %cst_17 : f32 to vector<8x8x128xf32>
      %c0_18 = arith.constant 0 : index
      %c0_19 = arith.constant 0 : index
      %c0_20 = arith.constant 0 : index
      %21 = vector.load %arg6[%c0_18, %c0_19, %c0_20] : memref<8x8x128xf32, #tpu.memory_space<vmem>>, vector<8x8x128xf32>
      tpu.vector_store %arg6[%c0_18, %c0_19, %c0_20], %20 {strides = array<i32>} : memref<8x8x128xf32, #tpu.memory_space<vmem>>, vector<8x8x128xf32>,
    } else {
    }
    %c0 = arith.constant 0 : index
    %c0_1 = arith.constant 0 : index
    %c0_2 = arith.constant 0 : index
    %3 = vector.load %arg2[%c0, %c0_1, %c0_2] : memref<8x256x32xbf16, #tpu.memory_space<vmem>>, vector<8x256x32xbf16>
    %4 = vector.shape_cast %3 : vector<8x256x32xbf16> to vector<2048x32xbf16>
    %c0_3 = arith.constant 0 : index
    %c0_4 = arith.constant 0 : index
    %5 = vector.load %arg3[%c0_3, %c0_4] : memref<32x128xbf16, #tpu.memory_space<vmem>>, vector<32x128xbf16>
    %cst = arith.constant dense<0.000000e+00> : vector<2048x128xf32>
    %6 = tpu.matmul %4, %5, %cst {dimension_numbers = #tpu.dot_dimension_numbers<[1], [0], [0], [1], [0, 0, 1, 1], [], []>} : vector<2048x32xbf16>, vector<32x128xbf16>, vector<2048x128xf32> -> vector<2048x128xf32>
    %c0_5 = arith.constant 0 : index
    %c0_6 = arith.constant 0 : index
    %7 = vector.load %arg4[%c0_5, %c0_6] : memref<1x128xf32, #tpu.memory_space<vmem>>, vector<1x128xf32>
    %8 = vector.broadcast %7 : vector<1x128xf32> to vector<2048x128xf32>
    %9 = arith.addf %6, %8 : vector<2048x128xf32>
    %cst_7 = arith.constant 0.000000e+00 : f32
    %10 = vector.broadcast %cst_7 : f32 to vector<2048x128xf32>
    %11 = arith.maximumf %9, %10 : vector<2048x128xf32>
    %c0_8 = arith.constant 0 : index
    %c0_9 = arith.constant 0 : index
    %c0_10 = arith.constant 0 : index
    %12 = vector.load %arg6[%c0_8, %c0_9, %c0_10] : memref<8x8x128xf32, #tpu.memory_space<vmem>>, vector<8x8x128xf32>
    %13 = vector.shape_cast %11 : vector<2048x128xf32> to vector<8x32x8x128xf32>
    %cst_11 = arith.constant dense<0.000000e+00> : vector<8x8x128xf32>
    %14 = vector.multi_reduction <add>, %13, %cst_11 [1] : vector<8x32x8x128xf32> to vector<8x8x128xf32>
    %15 = arith.addf %12, %14 : vector<8x8x128xf32>
    %c0_12 = arith.constant 0 : index
    %c0_13 = arith.constant 0 : index
    %c0_14 = arith.constant 0 : index
    %16 = vector.load %arg6[%c0_12, %c0_13, %c0_14] : memref<8x8x128xf32, #tpu.memory_space<vmem>>, vector<8x8x128xf32>
    tpu.vector_store %arg6[%c0_12, %c0_13, %c0_14], %15 {strides = array<i32>} : memref<8x8x128xf32, #tpu.memory_space<vmem>>, vector<8x8x128xf32>,
    %c0_i32_15 = arith.constant 0 : i32
    %17 = arith.cmpi eq, %arg1, %c0_i32_15 : i32
    %18 = arith.extui %17 : i1 to i32
    %c0_i32_16 = arith.constant 0 : i32
    %19 = arith.cmpi ne, %18, %c0_i32_16 : i32
    scf.if %19 {
      %c0_17 = arith.constant 0 : index
      %c0_18 = arith.constant 0 : index
      %c0_19 = arith.constant 0 : index
      %20 = vector.load %arg6[%c0_17, %c0_18, %c0_19] : memref<8x8x128xf32, #tpu.memory_space<vmem>>, vector<8x8x128xf32>
      %cst_20 = arith.constant dense<0.000000e+00> : vector<8x128xf32>
      %21 = vector.multi_reduction <add>, %20, %cst_20 [1] : vector<8x8x128xf32> to vector<8x128xf32>
      %cst_21 = arith.constant 3.906250e-03 : f32
      %22 = vector.broadcast %cst_21 : f32 to vector<8x128xf32>
      %23 = arith.mulf %21, %22 : vector<8x128xf32>
      %c0_22 = arith.constant 0 : index
      %c0_23 = arith.constant 0 : index
      %24 = vector.load %arg5[%c0_22, %c0_23] : memref<8x128xf32, #tpu.memory_space<vmem>>, vector<8x128xf32>
      tpu.vector_store %arg5[%c0_22, %c0_23], %23 {strides = array<i32>} : memref<8x128xf32, #tpu.memory_space<vmem>>, vector<8x128xf32>,
    } else {
    }
    return
  }
  func.func @transform_0(%arg0: i32, %arg1: i32) -> (i32, i32, i32) {
    %c0_i32 = arith.constant 0 : i32
    %c0_i32_0 = arith.constant 0 : i32
    return %arg0, %arg1, %c0_i32 : i32, i32, i32
  }
  func.func @transform_1(%arg0: i32, %arg1: i32) -> (i32, i32) {
    %c0_i32 = arith.constant 0 : i32
    %c0_i32_0 = arith.constant 0 : i32
    %c0_i32_1 = arith.constant 0 : i32
    return %c0_i32, %c0_i32_0 : i32, i32
  }
  func.func @transform_2(%arg0: i32, %arg1: i32) -> (i32, i32) {
    %c0_i32 = arith.constant 0 : i32
    %c0_i32_0 = arith.constant 0 : i32
    %c0_i32_1 = arith.constant 0 : i32
    return %c0_i32, %c0_i32_0 : i32, i32
  }
  func.func @transform_3(%arg0: i32, %arg1: i32) -> (i32, i32) {
    %c0_i32 = arith.constant 0 : i32
    %c0_i32_0 = arith.constant 0 : i32
    return %arg0, %c0_i32 : i32, i32
  }
}

</mosaic_0001>

<bundles_post_ra>
// kernel: tpu_custom_call.1
= control target key start
LH: loop header
LB: loop body
LE: loop exit
PB: predicated region body
PF: predicated region fallthrough
CT: control target
= control target key end

     0   :  { %vm947_vm0 = vcmask 261120   ;;  %s4663_s0 = inlined_call_operand.vmem [shape: bf16[8,256,32], index: 0, kind: input, shape index: {}]   ;;  %s4664_s1 = inlined_call_operand.vmem [shape: bf16[32,128], index: 1, kind: input, shape index: {}]   ;;  %s4665_s2 = inlined_call_operand.vmem [shape: f32[1,128], index: 2, kind: input, shape index: {}]   ;;  %s4666_s3 = inlined_call_operand.hbm [shape: f32[8,128], index: 3, kind: output, shape index: {}]  }
   0x1   :  { %v3676_v0 = vld [vmem:[%s4664_s1] sm:$0xff]   ;;  %v3677_v1 = vld [vmem:[%s4664_s1 + $0x8] sm:$0xff]   ;;  %v3682_v6 = vld [vmem:[%s4663_s0 + $0x10] sm:$0xff]  }
   0x2   :  { %3411 = vmatprep.subr.bf16.mxu0 %v3676_v0  ;;  %3671 = vmatprep.subr.bf16.mxu1 %v3676_v0  ;;  %v3678_v2 = vld [vmem:[%s4663_s0] sm:$0xff]   ;;  %v3680_v4 = vld [vmem:[%s4663_s0 + $0x8] sm:$0xff]   ;;  %v3683_v7 = vld [vmem:[%s4663_s0 + $0x210] sm:$0xff]  }
   0x3   :  { %3412 = vmatpush3.bf16.msra.mxu0 %v3676_v0  ;;  %3673 = vmatpush3.bf16.msra.mxu1 %v3676_v0  ;;  %v3679_v3 = vld [vmem:[%s4663_s0 + $0x200] sm:$0xff]   ;;  %v3681_v5 = vld [vmem:[%s4663_s0 + $0x208] sm:$0xff]   ;;  %v3684_v8 = vld [vmem:[%s4663_s0 + $0x18] sm:$0xff]  }
   0x4   :  { %3413 = vmatprep.subr.bf16.mxu0 %v3677_v1  ;;  %3672 = vmatprep.subr.bf16.mxu1 %v3677_v1  ;;  %v3685_v9 = vld [vmem:[%s4663_s0 + $0x218] sm:$0xff]   ;;  %v3686_v10 = vld [vmem:[%s4663_s0 + $0x20] sm:$0xff]   ;;  %v3688_v12 = vld [vmem:[%s4663_s0 + $0x28] sm:$0xff]  }
   0x5   :  { %3415 = vmatprep.mubr.msk.bf16.mxu0 %vm947_vm0, %v3678_v2  ;;  %3543 = vmatprep.mubr.msk.bf16.mxu1 %vm947_vm0, %v3679_v3  ;;  %v3687_v11 = vld [vmem:[%s4663_s0 + $0x220] sm:$0xff]   ;;  %v3689_v13 = vld [vmem:[%s4663_s0 + $0x228] sm:$0xff]   ;;  %v3690_v14 = vld [vmem:[%s4663_s0 + $0x30] sm:$0xff]  }
   0x6   :  { %v3691_v15 = vld [vmem:[%s4663_s0 + $0x230] sm:$0xff]   ;;  %v3692_v16 = vld [vmem:[%s4663_s0 + $0x38] sm:$0xff]   ;;  %v3694_v18 = vld [vmem:[%s4663_s0 + $0x40] sm:$0xff]  }
   0x7   :  { %3414 = vmatpush3.bf16.msra.mxu0 %v3677_v1  ;;  %3674 = vmatpush3.bf16.msra.mxu1 %v3677_v1  ;;  %v3693_v17 = vld [vmem:[%s4663_s0 + $0x238] sm:$0xff]   ;;  %v3695_v19 = vld [vmem:[%s4663_s0 + $0x240] sm:$0xff]   ;;  %v3696_v20 = vld [vmem:[%s4663_s0 + $0x48] sm:$0xff]  }
   0x8   :  { %v3697_v21 = vld [vmem:[%s4663_s0 + $0x248] sm:$0xff]   ;;  %v3698_v22 = vld [vmem:[%s4663_s0 + $0x50] sm:$0xff]   ;;  %v3700_v24 = vld [vmem:[%s4663_s0 + $0x58] sm:$0xff]  }
   0x9   :  { %v3699_v23 = vld [vmem:[%s4663_s0 + $0x250] sm:$0xff]   ;;  %v3701_v25 = vld [vmem:[%s4663_s0 + $0x258] sm:$0xff]   ;;  %v3702_v26 = vld [vmem:[%s4663_s0 + $0x60] sm:$0xff]  }
   0xa   :  { %3416 = vmatmul.mubr.msk.bf16.vlgmr.msra.gmra.mrb[0].mxu0 %vm947_vm0, %v3680_v4  ;;  %3544 = vmatmul.mubr.msk.bf16.vlgmr.msra.gmra.mrb[0].mxu1 %vm947_vm0, %v3681_v5  ;;  %v3703_v27 = vld [vmem:[%s4663_s0 + $0x260] sm:$0xff]   ;;  %v3704_v28 = vld [vmem:[%s4663_s0 + $0x68] sm:$0xff]   ;;  %v3706_v30 = vld [vmem:[%s4663_s0 + $0x70] sm:$0xff]  }
   0xb   :  { %3419 = vmatprep.mubr.msk.bf16.mxu0 %vm947_vm0, %v3682_v6  ;;  %3547 = vmatprep.mubr.msk.bf16.mxu1 %vm947_vm0, %v3683_v7  ;;  %v3705_v29 = vld [vmem:[%s4663_s0 + $0x268] sm:$0xff]   ;;  %v3707_v31 = vld [vmem:[%s4663_s0 + $0x270] sm:$0xff]   ;;  %v3708_v32 = vld [vmem:[%s4663_s0 + $0x78] sm:$0xff]  }
   0xc   :  { %v3709_v33 = vld [vmem:[%s4663_s0 + $0x278] sm:$0xff]   ;;  %v3710_v34 = vld [vmem:[%s4663_s0 + $0x80] sm:$0xff]   ;;  %v3712_v36 = vld [vmem:[%s4663_s0 + $0x88] sm:$0xff]  }
   0xd   :  { %v3711_v35 = vld [vmem:[%s4663_s0 + $0x280] sm:$0xff]   ;;  %v3713_v37 = vld [vmem:[%s4663_s0 + $0x288] sm:$0xff]   ;;  %v3714_v38 = vld [vmem:[%s4663_s0 + $0x90] sm:$0xff]  }
   0xe   :  { %v3715_v39 = vld [vmem:[%s4663_s0 + $0x290] sm:$0xff]   ;;  %v3716_v40 = vld [vmem:[%s4663_s0 + $0x98] sm:$0xff]   ;;  %v3718_v42 = vld [vmem:[%s4663_s0 + $0xa0] sm:$0xff]  }
   0xf   :  { %v3717_v41 = vld [vmem:[%s4663_s0 + $0x298] sm:$0xff]   ;;  %v3719_v43 = vld [vmem:[%s4663_s0 + $0x2a0] sm:$0xff]   ;;  %v3720_v44 = vld [vmem:[%s4663_s0 + $0xa8] sm:$0xff]  }
  0x10   :  { %v3721_v45 = vld [vmem:[%s4663_s0 + $0x2a8] sm:$0xff]   ;;  %v3722_v46 = vld [vmem:[%s4663_s0 + $0xb0] sm:$0xff]   ;;  %v3724_v48 = vld [vmem:[%s4663_s0 + $0xb8] sm:$0xff]  }
  0x11   :  { %v3723_v47 = vld [vmem:[%s4663_s0 + $0x2b0] sm:$0xff]   ;;  %v3725_v49 = vld [vmem:[%s4663_s0 + $0x2b8] sm:$0xff]   ;;  %v3726_v50 = vld [vmem:[%s4663_s0 + $0xc0] sm:$0xff]  }
  0x12   :  { %3420 = vmatmul.mubr.msk.bf16.gmra.mrb[4].mxu0 %vm947_vm0, %v3684_v8  ;;  %3548 = vmatmul.mubr.msk.bf16.gmra.mrb[4].mxu1 %vm947_vm0, %v3685_v9  ;;  %v3727_v51 = vld [vmem:[%s4663_s0 + $0x2c0] sm:$0xff]   ;;  %v3728_v52 = vld [vmem:[%s4663_s0 + $0xc8] sm:$0xff]   ;;  %v3730_v54 = vld [vmem:[%s4663_s0 + $0xd0] sm:$0xff]  }
  0x13   :  { %3423 = vmatprep.mubr.msk.bf16.mxu0 %vm947_vm0, %v3686_v10  ;;  %3551 = vmatprep.mubr.msk.bf16.mxu1 %vm947_vm0, %v3687_v11  ;;  %v3729_v53 = vld [vmem:[%s4663_s0 + $0x2c8] sm:$0xff]   ;;  %v3731_v55 = vld [vmem:[%s4663_s0 + $0x2d0] sm:$0xff]   ;;  %v3732_v56 = vld [vmem:[%s4663_s0 + $0xd8] sm:$0xff]  }
  0x14   :  { %v3733_v57 = vld [vmem:[%s4663_s0 + $0x2d8] sm:$0xff]   ;;  %v3734_v58 = vld [vmem:[%s4663_s0 + $0xe0] sm:$0xff]   ;;  %v3736_v60 = vld [vmem:[%s4663_s0 + $0xe8] sm:$0xff]  }
  0x15   :  { %v3735_v59 = vld [vmem:[%s4663_s0 + $0x2e0] sm:$0xff]   ;;  %v3737_v61 = vld [vmem:[%s4663_s0 + $0x2e8] sm:$0xff]   ;;  %v3738_v62 = vld [vmem:[%s4663_s0 + $0xf0] sm:$0xff]  }
  0x16   :  { %v3739_v63 = vld [vmem:[%s4663_s0 + $0x2f0] sm:$0xff]   ;;  %v3740_v0 = vld [vmem:[%s4663_s0 + $0xf8] sm:$0xff]   ;;  %v3742_v2 = vld [vmem:[%s4663_s0 + $0x100] sm:$0xff]  }
  0x17   :  { %v3741_v1 = vld [vmem:[%s4663_s0 + $0x2f8] sm:$0xff]   ;;  %v3743_v3 = vld [vmem:[%s4663_s0 + $0x300] sm:$0xff]  }
  0x1a   :  { %3424 = vmatmul.mubr.msk.bf16.gmra.mrb[8].mxu0 %vm947_vm0, %v3688_v12  ;;  %3552 = vmatmul.mubr.msk.bf16.gmra.mrb[8].mxu1 %vm947_vm0, %v3689_v13 }
  0x1b   :  { %3427 = vmatprep.mubr.msk.bf16.mxu0 %vm947_vm0, %v3690_v14  ;;  %3555 = vmatprep.mubr.msk.bf16.mxu1 %vm947_vm0, %v3691_v15 }
  0x22   :  { %3428 = vmatmul.mubr.msk.bf16.gmra.mrb[12].mxu0 %vm947_vm0, %v3692_v16  ;;  %3556 = vmatmul.mubr.msk.bf16.gmra.mrb[12].mxu1 %vm947_vm0, %v3693_v17 }
  0x23   :  { %3431 = vmatprep.mubr.msk.bf16.mxu0 %vm947_vm0, %v3694_v18  ;;  %3559 = vmatprep.mubr.msk.bf16.mxu1 %vm947_vm0, %v3695_v19 }
  0x2a   :  { %3432 = vmatmul.mubr.msk.bf16.gmra.mrb[16].mxu0 %vm947_vm0, %v3696_v20  ;;  %3560 = vmatmul.mubr.msk.bf16.gmra.mrb[16].mxu1 %vm947_vm0, %v3697_v21 }
  0x2b   :  { %3435 = vmatprep.mubr.msk.bf16.mxu0 %vm947_vm0, %v3698_v22  ;;  %3563 = vmatprep.mubr.msk.bf16.mxu1 %vm947_vm0, %v3699_v23 }
  0x32   :  { %3436 = vmatmul.mubr.msk.bf16.gmra.mrb[20].mxu0 %vm947_vm0, %v3700_v24  ;;  %3564 = vmatmul.mubr.msk.bf16.gmra.mrb[20].mxu1 %vm947_vm0, %v3701_v25 }
  0x33   :  { %3439 = vmatprep.mubr.msk.bf16.mxu0 %vm947_vm0, %v3702_v26  ;;  %3567 = vmatprep.mubr.msk.bf16.mxu1 %vm947_vm0, %v3703_v27 }
  0x3a   :  { %3440 = vmatmul.mubr.msk.bf16.gmra.mrb[24].mxu0 %vm947_vm0, %v3704_v28  ;;  %3568 = vmatmul.mubr.msk.bf16.gmra.mrb[24].mxu1 %vm947_vm0, %v3705_v29 }
  0x3b   :  { %3443 = vmatprep.mubr.msk.bf16.mxu0 %vm947_vm0, %v3706_v30  ;;  %3571 = vmatprep.mubr.msk.bf16.mxu1 %vm947_vm0, %v3707_v31 }
  0x42   :  { %3444 = vmatmul.mubr.msk.bf16.gmra.mrb[28].mxu0 %vm947_vm0, %v3708_v32  ;;  %3572 = vmatmul.mubr.msk.bf16.gmra.mrb[28].mxu1 %vm947_vm0, %v3709_v33 }
  0x43   :  { %3447 = vmatprep.mubr.msk.bf16.mxu0 %vm947_vm0, %v3710_v34  ;;  %3575 = vmatprep.mubr.msk.bf16.mxu1 %vm947_vm0, %v3711_v35 }
  0x4a   :  { %3448 = vmatmul.mubr.msk.bf16.gmra.mrb[32].mxu0 %vm947_vm0, %v3712_v36  ;;  %3576 = vmatmul.mubr.msk.bf16.gmra.mrb[32].mxu1 %vm947_vm0, %v3713_v37 }
  0x4b   :  { %3451 = vmatprep.mubr.msk.bf16.mxu0 %vm947_vm0, %v3714_v38  ;;  %3579 = vmatprep.mubr.msk.bf16.mxu1 %vm947_vm0, %v3715_v39 }
  0x52   :  { %3452 = vmatmul.mubr.msk.bf16.gmra.mrb[36].mxu0 %vm947_vm0, %v3716_v40  ;;  %3580 = vmatmul.mubr.msk.bf16.gmra.mrb[36].mxu1 %vm947_vm0, %v3717_v41 }
  0x53   :  { %3455 = vmatprep.mubr.msk.bf16.mxu0 %vm947_vm0, %v3718_v42  ;;  %3583 = vmatprep.mubr.msk.bf16.mxu1 %vm947_vm0, %v3719_v43 }
  0x5a   :  { %3456 = vmatmul.mubr.msk.bf16.gmra.mrb[40].mxu0 %vm947_vm0, %v3720_v44  ;;  %3584 = vmatmul.mubr.msk.bf16.gmra.mrb[40].mxu1 %vm947_vm0, %v3721_v45 }
  0x5b   :  { %3459 = vmatprep.mubr.msk.bf16.mxu0 %vm947_vm0, %v3722_v46  ;;  %3587 = vmatprep.mubr.msk.bf16.mxu1 %vm947_vm0, %v3723_v47 }
  0x62   :  { %3460 = vmatmul.mubr.msk.bf16.gmra.mrb[44].mxu0 %vm947_vm0, %v3724_v48  ;;  %3588 = vmatmul.mubr.msk.bf16.gmra.mrb[44].mxu1 %vm947_vm0, %v3725_v49 }
  0x63   :  { %3463 = vmatprep.mubr.msk.bf16.mxu0 %vm947_vm0, %v3726_v50  ;;  %3591 = vmatprep.mubr.msk.bf16.mxu1 %vm947_vm0, %v3727_v51 }
  0x6a   :  { %3464 = vmatmul.mubr.msk.bf16.gmra.mrb[48].mxu0 %vm947_vm0, %v3728_v52  ;;  %3592 = vmatmul.mubr.msk.bf16.gmra.mrb[48].mxu1 %vm947_vm0, %v3729_v53 }
  0x6b   :  { %3467 = vmatprep.mubr.msk.bf16.mxu0 %vm947_vm0, %v3730_v54  ;;  %3595 = vmatprep.mubr.msk.bf16.mxu1 %vm947_vm0, %v3731_v55 }
  0x72   :  { %3468 = vmatmul.mubr.msk.bf16.gmra.mrb[52].mxu0 %vm947_vm0, %v3732_v56  ;;  %3596 = vmatmul.mubr.msk.bf16.gmra.mrb[52].mxu1 %vm947_vm0, %v3733_v57 }
  0x73   :  { %3471 = vmatprep.mubr.msk.bf16.mxu0 %vm947_vm0, %v3734_v58  ;;  %3599 = vmatprep.mubr.msk.bf16.mxu1 %vm947_vm0, %v3735_v59 }
  0x7a   :  { %3472 = vmatmul.mubr.msk.bf16.gmra.mrb[56].mxu0 %vm947_vm0, %v3736_v60  ;;  %3600 = vmatmul.mubr.msk.bf16.gmra.mrb[56].mxu1 %vm947_vm0, %v3737_v61 }
  0x7b   :  { %3475 = vmatprep.mubr.msk.bf16.mxu0 %vm947_vm0, %v3738_v62  ;;  %3603 = vmatprep.mubr.msk.bf16.mxu1 %vm947_vm0, %v3739_v63 }
  0x82   :  { %3476 = vmatmul.mubr.msk.bf16.gmra.mrb[60].mxu0 %vm947_vm0, %v3740_v0  ;;  %3604 = vmatmul.mubr.msk.bf16.gmra.mrb[60].mxu1 %vm947_vm0, %v3741_v1 }
  0x83   :  { %8 = vsyncpa [#allocation4], 0  ;;  %3479 = vmatprep.mubr.msk.bf16.mxu0 %vm947_vm0, %v3742_v2  ;;  %3607 = vmatprep.mubr.msk.bf16.mxu1 %vm947_vm0, %v3743_v3  ;;  %v3744_v4 = vld [vmem:[%s4663_s0 + $0x108] sm:$0xff]   ;;  %v3746_v6 = vld [vmem:[%s4663_s0 + $0x110] sm:$0xff]   ;;  %vm2992_vm1 = vcmask 1041409   ;;  %vm2994_vm2 = vcmask 1042434  }
  0x84   :  { %v3745_v5 = vld [vmem:[%s4663_s0 + $0x308] sm:$0xff]   ;;  %v3747_v7 = vld [vmem:[%s4663_s0 + $0x310] sm:$0xff]   ;;  %v3748_v8 = vld [vmem:[%s4663_s0 + $0x118] sm:$0xff]   ;;  %vm2996_vm3 = vcmask 1043459   ;;  %vm2998_vm4 = vcmask 1044484   ;;  %vm3000_vm5 = vcmask 1045509  }
  0x85   :  { %v3749_v9 = vld [vmem:[%s4663_s0 + $0x318] sm:$0xff]   ;;  %v3750_v10 = vld [vmem:[%s4663_s0 + $0x120] sm:$0xff]   ;;  %v3752_v12 = vld [vmem:[%s4663_s0 + $0x128] sm:$0xff]   ;;  %vm3002_vm6 = vcmask 1046534   ;;  %vm3004_vm7 = vcmask 1047559  }
  0x86   :  { %v3751_v11 = vld [vmem:[%s4663_s0 + $0x320] sm:$0xff]   ;;  %v3753_v13 = vld [vmem:[%s4663_s0 + $0x328] sm:$0xff]   ;;  %v3754_v14 = vld [vmem:[%s4663_s0 + $0x130] sm:$0xff]  }
  0x87   :  { %v3755_v15 = vld [vmem:[%s4663_s0 + $0x330] sm:$0xff]   ;;  %v3756_v16 = vld [vmem:[%s4663_s0 + $0x138] sm:$0xff]   ;;  %v3758_v18 = vld [vmem:[%s4663_s0 + $0x140] sm:$0xff]  }
  0x88   :  { %v3757_v17 = vld [vmem:[%s4663_s0 + $0x338] sm:$0xff]   ;;  %v3759_v19 = vld [vmem:[%s4663_s0 + $0x340] sm:$0xff]   ;;  %v3760_v20 = vld [vmem:[%s4663_s0 + $0x148] sm:$0xff]  }
  0x89   :  { %v3761_v21 = vld [vmem:[%s4663_s0 + $0x348] sm:$0xff]   ;;  %v3762_v22 = vld [vmem:[%s4663_s0 + $0x150] sm:$0xff]   ;;  %v3764_v24 = vld [vmem:[%s4663_s0 + $0x158] sm:$0xff]  }
  0x8a   :  { %3480 = vmatmul.mubr.msk.bf16.gmra.mrb[64].mxu0 %vm947_vm0, %v3744_v4  ;;  %3608 = vmatmul.mubr.msk.bf16.gmra.mrb[64].mxu1 %vm947_vm0, %v3745_v5  ;;  %v3763_v23 = vld [vmem:[%s4663_s0 + $0x350] sm:$0xff]   ;;  %v3765_v25 = vld [vmem:[%s4663_s0 + $0x358] sm:$0xff]   ;;  %v3766_v26 = vld [vmem:[%s4663_s0 + $0x160] sm:$0xff]  }
  0x8b   :  { %3483 = vmatprep.mubr.msk.bf16.mxu0 %vm947_vm0, %v3746_v6  ;;  %3611 = vmatprep.mubr.msk.bf16.mxu1 %vm947_vm0, %v3747_v7  ;;  %v3767_v27 = vld [vmem:[%s4663_s0 + $0x360] sm:$0xff]   ;;  %v3768_v28 = vld [vmem:[%s4663_s0 + $0x168] sm:$0xff]   ;;  %v3770_v30 = vld [vmem:[%s4663_s0 + $0x170] sm:$0xff]  }
  0x8c   :  { %v3769_v29 = vld [vmem:[%s4663_s0 + $0x368] sm:$0xff]   ;;  %v3771_v31 = vld [vmem:[%s4663_s0 + $0x370] sm:$0xff]   ;;  %v3772_v32 = vld [vmem:[%s4663_s0 + $0x178] sm:$0xff]  }
  0x8d   :  { %v3773_v33 = vld [vmem:[%s4663_s0 + $0x378] sm:$0xff]   ;;  %v3774_v34 = vld [vmem:[%s4663_s0 + $0x180] sm:$0xff]   ;;  %v3776_v36 = vld [vmem:[%s4663_s0 + $0x188] sm:$0xff]  }
  0x8e   :  { %v3775_v35 = vld [vmem:[%s4663_s0 + $0x380] sm:$0xff]   ;;  %v3777_v37 = vld [vmem:[%s4663_s0 + $0x388] sm:$0xff]   ;;  %v3778_v38 = vld [vmem:[%s4663_s0 + $0x190] sm:$0xff]  }
  0x8f   :  { %v3779_v39 = vld [vmem:[%s4663_s0 + $0x390] sm:$0xff]   ;;  %v3780_v40 = vld [vmem:[%s4663_s0 + $0x198] sm:$0xff]   ;;  %v3782_v42 = vld [vmem:[%s4663_s0 + $0x1a0] sm:$0xff]  }
  0x90   :  { %v3781_v41 = vld [vmem:[%s4663_s0 + $0x398] sm:$0xff]   ;;  %v3783_v43 = vld [vmem:[%s4663_s0 + $0x3a0] sm:$0xff]   ;;  %v3784_v44 = vld [vmem:[%s4663_s0 + $0x1a8] sm:$0xff]  }
  0x91   :  { %v3785_v45 = vld [vmem:[%s4663_s0 + $0x3a8] sm:$0xff]   ;;  %v3786_v46 = vld [vmem:[%s4663_s0 + $0x1b0] sm:$0xff]   ;;  %v4302_v48 = vld [vmem:[%s4665_s2] ss:$0 sm:$0xff] }
  0x92   :  { %3484 = vmatmul.mubr.msk.bf16.gmra.mrb[68].mxu0 %vm947_vm0, %v3748_v8  ;;  %3612 = vmatmul.mubr.msk.bf16.gmra.mrb[68].mxu1 %vm947_vm0, %v3749_v9  ;;  %v3787_v47 = vld [vmem:[%s4663_s0 + $0x3b0] sm:$0xff]   ;;  %v3788_v53 = vld [vmem:[%s4663_s0 + $0x1b8] sm:$0xff]   ;;  %v3790_v60 = vld [vmem:[%s4663_s0 + $0x1c0] sm:$0xff]  }
  0x93   :  { %3487 = vmatprep.mubr.msk.bf16.mxu0 %vm947_vm0, %v3750_v10  ;;  %3615 = vmatprep.mubr.msk.bf16.mxu1 %vm947_vm0, %v3751_v11  ;;  %v3789_v54 = vld [vmem:[%s4663_s0 + $0x3b8] sm:$0xff]   ;;  %v3791_v61 = vld [vmem:[%s4663_s0 + $0x3c0] sm:$0xff]  }
  0x9a   :  { %3488 = vmatmul.mubr.msk.bf16.gmra.mrb[72].mxu0 %vm947_vm0, %v3752_v12  ;;  %3616 = vmatmul.mubr.msk.bf16.gmra.mrb[72].mxu1 %vm947_vm0, %v3753_v13 }
  0x9b   :  { %3491 = vmatprep.mubr.msk.bf16.mxu0 %vm947_vm0, %v3754_v14  ;;  %3619 = vmatprep.mubr.msk.bf16.mxu1 %vm947_vm0, %v3755_v15 }
  0xa2   :  { %3492 = vmatmul.mubr.msk.bf16.gmra.mrb[76].mxu0 %vm947_vm0, %v3756_v16  ;;  %3620 = vmatmul.mubr.msk.bf16.gmra.mrb[76].mxu1 %vm947_vm0, %v3757_v17 }
  0xa3   :  { %3495 = vmatprep.mubr.msk.bf16.mxu0 %vm947_vm0, %v3758_v18  ;;  %3623 = vmatprep.mubr.msk.bf16.mxu1 %vm947_vm0, %v3759_v19 }
  0xaa   :  { %3496 = vmatmul.mubr.msk.bf16.gmra.mrb[80].mxu0 %vm947_vm0, %v3760_v20  ;;  %3624 = vmatmul.mubr.msk.bf16.gmra.mrb[80].mxu1 %vm947_vm0, %v3761_v21  ;;  %v3792_v20 = vld [vmem:[%s4663_s0 + $0x1c8] sm:$0xff]  }
  0xab   :  { %3499 = vmatprep.mubr.msk.bf16.mxu0 %vm947_vm0, %v3762_v22  ;;  %3627 = vmatprep.mubr.msk.bf16.mxu1 %vm947_vm0, %v3763_v23  ;;  %v3793_v21 = vld [vmem:[%s4663_s0 + $0x3c8] sm:$0xff]  }
  0xb2   :  { %3500 = vmatmul.mubr.msk.bf16.gmra.mrb[84].mxu0 %vm947_vm0, %v3764_v24  ;;  %3628 = vmatmul.mubr.msk.bf16.gmra.mrb[84].mxu1 %vm947_vm0, %v3765_v25 }
  0xb3   :  { %3503 = vmatprep.mubr.msk.bf16.mxu0 %vm947_vm0, %v3766_v26  ;;  %3631 = vmatprep.mubr.msk.bf16.mxu1 %vm947_vm0, %v3767_v27 }
  0xba   :  { %3504 = vmatmul.mubr.msk.bf16.gmra.mrb[88].mxu0 %vm947_vm0, %v3768_v28  ;;  %3632 = vmatmul.mubr.msk.bf16.gmra.mrb[88].mxu1 %vm947_vm0, %v3769_v29  ;;  %v3794_v28 = vld [vmem:[%s4663_s0 + $0x1d0] sm:$0xff]  }
  0xbb   :  { %3507 = vmatprep.mubr.msk.bf16.mxu0 %vm947_vm0, %v3770_v30  ;;  %3635 = vmatprep.mubr.msk.bf16.mxu1 %vm947_vm0, %v3771_v31  ;;  %v3795_v29 = vld [vmem:[%s4663_s0 + $0x3d0] sm:$0xff]  }
  0xc2   :  { %3508 = vmatmul.mubr.msk.bf16.gmra.mrb[92].mxu0 %vm947_vm0, %v3772_v32  ;;  %3636 = vmatmul.mubr.msk.bf16.gmra.mrb[92].mxu1 %vm947_vm0, %v3773_v33 }
  0xc3   :  { %3511 = vmatprep.mubr.msk.bf16.mxu0 %vm947_vm0, %v3774_v34  ;;  %3639 = vmatprep.mubr.msk.bf16.mxu1 %vm947_vm0, %v3775_v35 }
  0xca   :  { %3512 = vmatmul.mubr.msk.bf16.gmra.mrb[96].mxu0 %vm947_vm0, %v3776_v36  ;;  %3640 = vmatmul.mubr.msk.bf16.gmra.mrb[96].mxu1 %vm947_vm0, %v3777_v37 }
  0xcb   :  { %3515 = vmatprep.mubr.msk.bf16.mxu0 %vm947_vm0, %v3778_v38  ;;  %3643 = vmatprep.mubr.msk.bf16.mxu1 %vm947_vm0, %v3779_v39 }
  0xd2   :  { %3516 = vmatmul.mubr.msk.bf16.gmra.mrb[100].mxu0 %vm947_vm0, %v3780_v40  ;;  %3644 = vmatmul.mubr.msk.bf16.gmra.mrb[100].mxu1 %vm947_vm0, %v3781_v41 }
  0xd3   :  { %3519 = vmatprep.mubr.msk.bf16.mxu0 %vm947_vm0, %v3782_v42  ;;  %3647 = vmatprep.mubr.msk.bf16.mxu1 %vm947_vm0, %v3783_v43 }
  0xda   :  { %3520 = vmatmul.mubr.msk.bf16.gmra.mrb[104].mxu0 %vm947_vm0, %v3784_v44  ;;  %3648 = vmatmul.mubr.msk.bf16.gmra.mrb[104].mxu1 %vm947_vm0, %v3785_v45 }
  0xdb   :  { %3523 = vmatprep.mubr.msk.bf16.mxu0 %vm947_vm0, %v3786_v46  ;;  %3651 = vmatprep.mubr.msk.bf16.mxu1 %vm947_vm0, %v3787_v47 }
  0xdd   :  { %v3417_v49 = vpop.f32.mrb[0].mxu0  ;;  %v3545_v50 = vpop.f32.mrb[0].mxu1 }
  0xde   :  { %v1366_v51 = vpop.f32.mrb[1].mxu0  ;;  %v1878_v52 = vpop.f32.mrb[1].mxu1  ;;  %v1887_v55 = vadd.f32 %v3545_v50, %v4302_v48  ;;  %v1375_v0 = vadd.f32 %v3417_v49, %v4302_v48 }
  0xdf   :  { %v1367_v56 = vadd.f32 %v4302_v48, %v1366_v51  ;;  %v1879_v57 = vadd.f32 %v4302_v48, %v1878_v52  ;;  %v3418_v58 = vpop.f32.mrb[2].mxu0  ;;  %v3546_v59 = vpop.f32.mrb[2].mxu1 }
  0xe0   :  { %v1369_v62 = vpop.f32.mrb[3].mxu0  ;;  %v1881_v63 = vpop.f32.mrb[3].mxu1  ;;  %v1378_v4 = vadd.f32 %v3418_v58, %v4302_v48  ;;  %v1890_v5 = vadd.f32 %v3546_v59, %v4302_v48  ;;  %v2519_v6 = vmax.f32 %v1887_v55, 0.0  ;;  %v2391_v10 = vmax.f32 %v1375_v0, 0.0 }
  0xe1   :  { %v2517_v1 = vmax.f32 %v1879_v57, 0.0  ;;  %v1370_v2 = vadd.f32 %v4302_v48, %v1369_v62  ;;  %v1882_v3 = vadd.f32 %v4302_v48, %v1881_v63  ;;  %v2389_v7 = vmax.f32 %v1367_v56, 0.0 }
  0xe2   :  { %3524 = vmatmul.mubr.msk.bf16.gmra.mrb[108].mxu0 %vm947_vm0, %v3788_v53  ;;  %3652 = vmatmul.mubr.msk.bf16.gmra.mrb[108].mxu1 %vm947_vm0, %v3789_v54  ;;  %v2392_v15 = vmax.f32 %v1378_v4, 0.0  ;;  %v2520_v16 = vmax.f32 %v1890_v5, 0.0  ;;  %v3796_v54 = vld [vmem:[%s4663_s0 + $0x1d8] sm:$0xff]   ;;  %v3799_v4 = vld [vmem:[%s4663_s0 + $0x3e0] sm:$0xff]  }
  0xe3   :  { %v2390_v8 = vmax.f32 %v1370_v2, 0.0  ;;  %v2518_v9 = vmax.f32 %v1882_v3, 0.0  ;;  %3527 = vmatprep.mubr.msk.bf16.mxu0 %vm947_vm0, %v3790_v60  ;;  %3655 = vmatprep.mubr.msk.bf16.mxu1 %vm947_vm0, %v3791_v61  ;;  %v3797_v60 = vld [vmem:[%s4663_s0 + $0x3d8] sm:$0xff]   ;;  %v3798_v61 = vld [vmem:[%s4663_s0 + $0x1e0] sm:$0xff]  }
  0xe5   :  { %v2653_v11 = vadd.f32 %v2390_v8, %v2389_v7  ;;  %v2777_v12 = vadd.f32 %v2518_v9, %v2517_v1  ;;  %v3421_v13 = vpop.f32.mrb[4].mxu0  ;;  %v3549_v14 = vpop.f32.mrb[4].mxu1 }
  0xe6   :  { %v1903_v17 = vadd.f32 %v3549_v14, %v4302_v48  ;;  %v1382_v18 = vpop.f32.mrb[5].mxu0  ;;  %v1894_v19 = vpop.f32.mrb[5].mxu1  ;;  %v1391_v36 = vadd.f32 %v3421_v13, %v4302_v48 }
  0xe7   :  { %v2654_v22 = vadd.f32 %v2653_v11, %v2391_v10  ;;  %v2778_v23 = vadd.f32 %v2777_v12, %v2519_v6  ;;  %v1383_v24 = vadd.f32 %v4302_v48, %v1382_v18  ;;  %v1895_v25 = vadd.f32 %v4302_v48, %v1894_v19  ;;  %v3422_v26 = vpop.f32.mrb[6].mxu0  ;;  %v3550_v27 = vpop.f32.mrb[6].mxu1 }
  0xe8   :  { %v1385_v30 = vpop.f32.mrb[7].mxu0  ;;  %v1897_v31 = vpop.f32.mrb[7].mxu1  ;;  %v2523_v39 = vmax.f32 %v1903_v17, 0.0  ;;  %v1394_v42 = vadd.f32 %v3422_v26, %v4302_v48  ;;  %v1906_v43 = vadd.f32 %v3550_v27, %v4302_v48  ;;  %v2395_v49 = vmax.f32 %v1391_v36, 0.0  ;;  %v3800_v26 = vld [vmem:[%s4663_s0 + $0x1e8] sm:$0xff]  }
  0xe9   :  { %v2393_v32 = vmax.f32 %v1383_v24, 0.0  ;;  %v2655_v33 = vadd.f32 %v2654_v22, %v2392_v15  ;;  %v2521_v34 = vmax.f32 %v1895_v25, 0.0  ;;  %v2779_v35 = vadd.f32 %v2778_v23, %v2520_v16 }
  0xea   :  { %v1386_v37 = vadd.f32 %v4302_v48, %v1385_v30  ;;  %v1898_v38 = vadd.f32 %v4302_v48, %v1897_v31  ;;  %3528 = vmatmul.mubr.msk.bf16.gmra.mrb[112].mxu0 %vm947_vm0, %v3792_v20  ;;  %3656 = vmatmul.mubr.msk.bf16.gmra.mrb[112].mxu1 %vm947_vm0, %v3793_v21  ;;  %v2396_v62 = vmax.f32 %v1394_v42, 0.0  ;;  %v2524_v63 = vmax.f32 %v1906_v43, 0.0 }
  0xeb   :  { %v2656_v40 = vadd.f32 %v2655_v33, %v2393_v32  ;;  %v2780_v41 = vadd.f32 %v2779_v35, %v2521_v34  ;;  %3531 = vmatprep.mubr.msk.bf16.mxu0 %vm947_vm0, %v3794_v28  ;;  %3659 = vmatprep.mubr.msk.bf16.mxu1 %vm947_vm0, %v3795_v29  ;;  %v3801_v32 = vld [vmem:[%s4663_s0 + $0x3e8] sm:$0xff]   ;;  %v3802_v33 = vld [vmem:[%s4663_s0 + $0x1f0] sm:$0xff]  }
  0xec   :  { %v2394_v44 = vmax.f32 %v1386_v37, 0.0  ;;  %v2522_v45 = vmax.f32 %v1898_v38, 0.0 }
  0xed   :  { %v3425_v46 = vpop.f32.mrb[8].mxu0  ;;  %v3553_v47 = vpop.f32.mrb[8].mxu1 }
  0xee   :  { %v2657_v50 = vadd.f32 %v2656_v40, %v2394_v44  ;;  %v2781_v51 = vadd.f32 %v2780_v41, %v2522_v45  ;;  %v1398_v52 = vpop.f32.mrb[9].mxu0  ;;  %v1910_v53 = vpop.f32.mrb[9].mxu1  ;;  %v1919_v55 = vadd.f32 %v3553_v47, %v4302_v48  ;;  %v1407_v5 = vadd.f32 %v3425_v46, %v4302_v48  ;;  %v3803_v40 = vld [vmem:[%s4663_s0 + $0x3f0] sm:$0xff]  }
  0xef   :  { %v1399_v56 = vadd.f32 %v4302_v48, %v1398_v52  ;;  %v1911_v57 = vadd.f32 %v4302_v48, %v1910_v53  ;;  %v3426_v58 = vpop.f32.mrb[10].mxu0  ;;  %v3554_v59 = vpop.f32.mrb[10].mxu1 }
  0xf0   :  { %v2658_v0 = vadd.f32 %v2657_v50, %v2395_v49  ;;  %v2782_v1 = vadd.f32 %v2781_v51, %v2523_v39  ;;  %v1401_v2 = vpop.f32.mrb[11].mxu0  ;;  %v1913_v3 = vpop.f32.mrb[11].mxu1  ;;  %v2527_v12 = vmax.f32 %v1919_v55, 0.0  ;;  %v1410_v13 = vadd.f32 %v3426_v58, %v4302_v48 }
  0xf1   :  { %v2397_v6 = vmax.f32 %v1399_v56, 0.0  ;;  %v2525_v7 = vmax.f32 %v1911_v57, 0.0  ;;  %v1402_v10 = vadd.f32 %v4302_v48, %v1401_v2  ;;  %v1914_v11 = vadd.f32 %v4302_v48, %v1913_v3 }
  0xf2   :  { %v2659_v8 = vadd.f32 %v2658_v0, %v2396_v62  ;;  %v2783_v9 = vadd.f32 %v2782_v1, %v2524_v63  ;;  %3532 = vmatmul.mubr.msk.bf16.gmra.mrb[116].mxu0 %vm947_vm0, %v3796_v54  ;;  %v1922_v14 = vadd.f32 %v3554_v59, %v4302_v48  ;;  %3660 = vmatmul.mubr.msk.bf16.gmra.mrb[116].mxu1 %vm947_vm0, %v3797_v60  ;;  %v2399_v21 = vmax.f32 %v1407_v5, 0.0  ;;  %v3804_v63 = vld [vmem:[%s4663_s0 + $0x1f8] sm:$0xff]  }
  0xf3   :  { %3535 = vmatprep.mubr.msk.bf16.mxu0 %vm947_vm0, %v3798_v61  ;;  %v2398_v17 = vmax.f32 %v1402_v10, 0.0  ;;  %v2526_v18 = vmax.f32 %v1914_v11, 0.0  ;;  %3663 = vmatprep.mubr.msk.bf16.mxu1 %vm947_vm0, %v3799_v4  ;;  %v2400_v34 = vmax.f32 %v1410_v13, 0.0  ;;  %v3805_v5 = vld [vmem:[%s4663_s0 + $0x3f8] sm:$0xff]  }
  0xf4   :  { %v2660_v15 = vadd.f32 %v2659_v8, %v2397_v6  ;;  %v2784_v16 = vadd.f32 %v2783_v9, %v2525_v7  ;;  %v2528_v35 = vmax.f32 %v1922_v14, 0.0 }
  0xf5   :  { %v3429_v19 = vpop.f32.mrb[12].mxu0  ;;  %v3557_v20 = vpop.f32.mrb[12].mxu1 }
  0xf6   :  { %v2661_v22 = vadd.f32 %v2660_v15, %v2398_v17  ;;  %v2785_v23 = vadd.f32 %v2784_v16, %v2526_v18  ;;  %v1414_v24 = vpop.f32.mrb[13].mxu0  ;;  %v1926_v25 = vpop.f32.mrb[13].mxu1  ;;  %v1935_v27 = vadd.f32 %v3557_v20, %v4302_v48  ;;  %v1423_v41 = vadd.f32 %v3429_v19, %v4302_v48 }
  0xf7   :  { %v1415_v28 = vadd.f32 %v4302_v48, %v1414_v24  ;;  %v1927_v29 = vadd.f32 %v4302_v48, %v1926_v25  ;;  %v3430_v30 = vpop.f32.mrb[14].mxu0  ;;  %v3558_v31 = vpop.f32.mrb[14].mxu1 }
  0xf8   :  { %v2662_v36 = vadd.f32 %v2661_v22, %v2399_v21  ;;  %v2786_v37 = vadd.f32 %v2785_v23, %v2527_v12  ;;  %v1417_v38 = vpop.f32.mrb[15].mxu0  ;;  %v1929_v39 = vpop.f32.mrb[15].mxu1  ;;  %v2531_v49 = vmax.f32 %v1935_v27, 0.0  ;;  %v1426_v50 = vadd.f32 %v3430_v30, %v4302_v48 }
  0xf9   :  { %v2401_v42 = vmax.f32 %v1415_v28, 0.0  ;;  %v2529_v43 = vmax.f32 %v1927_v29, 0.0  ;;  %v1418_v46 = vadd.f32 %v4302_v48, %v1417_v38  ;;  %v1930_v47 = vadd.f32 %v4302_v48, %v1929_v39 }
  0xfa   :  { %v2663_v44 = vadd.f32 %v2662_v36, %v2400_v34  ;;  %v2787_v45 = vadd.f32 %v2786_v37, %v2528_v35  ;;  %3536 = vmatmul.mubr.msk.bf16.gmra.mrb[120].mxu0 %vm947_vm0, %v3800_v26  ;;  %v1938_v51 = vadd.f32 %v3558_v31, %v4302_v48  ;;  %3664 = vmatmul.mubr.msk.bf16.gmra.mrb[120].mxu1 %vm947_vm0, %v3801_v32  ;;  %v2403_v58 = vmax.f32 %v1423_v41, 0.0 }
  0xfb   :  { %3539 = vmatprep.mubr.msk.bf16.mxu0 %vm947_vm0, %v3802_v33  ;;  %v2402_v54 = vmax.f32 %v1418_v46, 0.0  ;;  %v2530_v55 = vmax.f32 %v1930_v47, 0.0  ;;  %3667 = vmatprep.mubr.msk.bf16.mxu1 %vm947_vm0, %v3803_v40  ;;  %v2404_v6 = vmax.f32 %v1426_v50, 0.0 }
  0xfc   :  { %v2664_v52 = vadd.f32 %v2663_v44, %v2401_v42  ;;  %v2788_v53 = vadd.f32 %v2787_v45, %v2529_v43  ;;  %v2532_v7 = vmax.f32 %v1938_v51, 0.0 }
  0xfd   :  { %v3433_v56 = vpop.f32.mrb[16].mxu0  ;;  %v3561_v57 = vpop.f32.mrb[16].mxu1 }
  0xfe   :  { %v2665_v59 = vadd.f32 %v2664_v52, %v2402_v54  ;;  %v2789_v60 = vadd.f32 %v2788_v53, %v2530_v55  ;;  %v1430_v61 = vpop.f32.mrb[17].mxu0  ;;  %v1942_v62 = vpop.f32.mrb[17].mxu1  ;;  %v1951_v0 = vadd.f32 %v3561_v57, %v4302_v48  ;;  %v1439_v12 = vadd.f32 %v3433_v56, %v4302_v48 }
  0xff   :  { %v1431_v1 = vadd.f32 %v4302_v48, %v1430_v61  ;;  %v1943_v2 = vadd.f32 %v4302_v48, %v1942_v62  ;;  %v3434_v3 = vpop.f32.mrb[18].mxu0  ;;  %v3562_v4 = vpop.f32.mrb[18].mxu1 }
 0x100   :  { %v2666_v8 = vadd.f32 %v2665_v59, %v2403_v58  ;;  %v2790_v9 = vadd.f32 %v2789_v60, %v2531_v49  ;;  %v1433_v10 = vpop.f32.mrb[19].mxu0  ;;  %v1945_v11 = vpop.f32.mrb[19].mxu1  ;;  %v2535_v19 = vmax.f32 %v1951_v0, 0.0  ;;  %v1442_v20 = vadd.f32 %v3434_v3, %v4302_v48 }
 0x101   :  { %v2405_v13 = vmax.f32 %v1431_v1, 0.0  ;;  %v2533_v14 = vmax.f32 %v1943_v2, 0.0  ;;  %v1434_v17 = vadd.f32 %v4302_v48, %v1433_v10  ;;  %v1946_v18 = vadd.f32 %v4302_v48, %v1945_v11 }
 0x102   :  { %v2667_v15 = vadd.f32 %v2666_v8, %v2404_v6  ;;  %v2791_v16 = vadd.f32 %v2790_v9, %v2532_v7  ;;  %3540 = vmatmul.mubr.msk.bf16.gmra.mrb[124].mxu0 %vm947_vm0, %v3804_v63  ;;  %v1954_v21 = vadd.f32 %v3562_v4, %v4302_v48  ;;  %3668 = vmatmul.mubr.msk.bf16.gmra.mrb[124].mxu1 %vm947_vm0, %v3805_v5  ;;  %v2407_v28 = vmax.f32 %v1439_v12, 0.0 }
 0x103   :  { %v2406_v24 = vmax.f32 %v1434_v17, 0.0  ;;  %v2534_v25 = vmax.f32 %v1946_v18, 0.0  ;;  %v2408_v38 = vmax.f32 %v1442_v20, 0.0 }
 0x104   :  { %v2668_v22 = vadd.f32 %v2667_v15, %v2405_v13  ;;  %v2792_v23 = vadd.f32 %v2791_v16, %v2533_v14  ;;  %v2536_v39 = vmax.f32 %v1954_v21, 0.0 }
 0x105   :  { %v3437_v26 = vpop.f32.mrb[20].mxu0  ;;  %v3565_v27 = vpop.f32.mrb[20].mxu1 }
 0x106   :  { %v2669_v29 = vadd.f32 %v2668_v22, %v2406_v24  ;;  %v2793_v30 = vadd.f32 %v2792_v23, %v2534_v25  ;;  %v1446_v31 = vpop.f32.mrb[21].mxu0  ;;  %v1958_v32 = vpop.f32.mrb[21].mxu1  ;;  %v1967_v33 = vadd.f32 %v3565_v27, %v4302_v48  ;;  %v1455_v44 = vadd.f32 %v3437_v26, %v4302_v48 }
 0x107   :  { %v1447_v34 = vadd.f32 %v4302_v48, %v1446_v31  ;;  %v1959_v35 = vadd.f32 %v4302_v48, %v1958_v32  ;;  %v3438_v36 = vpop.f32.mrb[22].mxu0  ;;  %v3566_v37 = vpop.f32.mrb[22].mxu1 }
 0x108   :  { %v2670_v40 = vadd.f32 %v2669_v29, %v2407_v28  ;;  %v2794_v41 = vadd.f32 %v2793_v30, %v2535_v19  ;;  %v1449_v42 = vpop.f32.mrb[23].mxu0  ;;  %v1961_v43 = vpop.f32.mrb[23].mxu1  ;;  %v2539_v52 = vmax.f32 %v1967_v33, 0.0  ;;  %v1458_v53 = vadd.f32 %v3438_v36, %v4302_v48 }
 0x109   :  { %v2409_v45 = vmax.f32 %v1447_v34, 0.0  ;;  %v2537_v46 = vmax.f32 %v1959_v35, 0.0  ;;  %v1450_v50 = vadd.f32 %v4302_v48, %v1449_v42  ;;  %v1962_v51 = vadd.f32 %v4302_v48, %v1961_v43 }
 0x10a   :  { %v2671_v47 = vadd.f32 %v2670_v40, %v2408_v38  ;;  %v2795_v49 = vadd.f32 %v2794_v41, %v2536_v39  ;;  %v1970_v54 = vadd.f32 %v3566_v37, %v4302_v48  ;;  %v2411_v61 = vmax.f32 %v1455_v44, 0.0 }
 0x10b   :  { %v2410_v57 = vmax.f32 %v1450_v50, 0.0  ;;  %v2538_v58 = vmax.f32 %v1962_v51, 0.0  ;;  %v2412_v7 = vmax.f32 %v1458_v53, 0.0 }
 0x10c   :  { %v2672_v55 = vadd.f32 %v2671_v47, %v2409_v45  ;;  %v2796_v56 = vadd.f32 %v2795_v49, %v2537_v46  ;;  %v2540_v8 = vmax.f32 %v1970_v54, 0.0 }
 0x10d   :  { %v3441_v59 = vpop.f32.mrb[24].mxu0  ;;  %v3569_v60 = vpop.f32.mrb[24].mxu1 }
 0x10e   :  { %v2673_v62 = vadd.f32 %v2672_v55, %v2410_v57  ;;  %v2797_v63 = vadd.f32 %v2796_v56, %v2538_v58  ;;  %v1462_v0 = vpop.f32.mrb[25].mxu0  ;;  %v1974_v1 = vpop.f32.mrb[25].mxu1  ;;  %v1983_v2 = vadd.f32 %v3569_v60, %v4302_v48  ;;  %v1471_v13 = vadd.f32 %v3441_v59, %v4302_v48 }
 0x10f   :  { %v1463_v3 = vadd.f32 %v4302_v48, %v1462_v0  ;;  %v1975_v4 = vadd.f32 %v4302_v48, %v1974_v1  ;;  %v3442_v5 = vpop.f32.mrb[26].mxu0  ;;  %v3570_v6 = vpop.f32.mrb[26].mxu1 }
 0x110   :  { %v2674_v9 = vadd.f32 %v2673_v62, %v2411_v61  ;;  %v2798_v10 = vadd.f32 %v2797_v63, %v2539_v52  ;;  %v1465_v11 = vpop.f32.mrb[27].mxu0  ;;  %v1977_v12 = vpop.f32.mrb[27].mxu1  ;;  %v2543_v20 = vmax.f32 %v1983_v2, 0.0  ;;  %v1474_v21 = vadd.f32 %v3442_v5, %v4302_v48 }
 0x111   :  { %v2413_v14 = vmax.f32 %v1463_v3, 0.0  ;;  %v2541_v15 = vmax.f32 %v1975_v4, 0.0  ;;  %v1466_v18 = vadd.f32 %v4302_v48, %v1465_v11  ;;  %v1978_v19 = vadd.f32 %v4302_v48, %v1977_v12 }
 0x112   :  { %v2675_v16 = vadd.f32 %v2674_v9, %v2412_v7  ;;  %v2799_v17 = vadd.f32 %v2798_v10, %v2540_v8  ;;  %v1986_v22 = vadd.f32 %v3570_v6, %v4302_v48  ;;  %v2415_v29 = vmax.f32 %v1471_v13, 0.0 }
 0x113   :  { %v2414_v25 = vmax.f32 %v1466_v18, 0.0  ;;  %v2542_v26 = vmax.f32 %v1978_v19, 0.0  ;;  %v2416_v39 = vmax.f32 %v1474_v21, 0.0 }
 0x114   :  { %v2676_v23 = vadd.f32 %v2675_v16, %v2413_v14  ;;  %v2800_v24 = vadd.f32 %v2799_v17, %v2541_v15  ;;  %v2544_v40 = vmax.f32 %v1986_v22, 0.0 }
 0x115   :  { %v3445_v27 = vpop.f32.mrb[28].mxu0  ;;  %v3573_v28 = vpop.f32.mrb[28].mxu1 }
 0x116   :  { %v2677_v30 = vadd.f32 %v2676_v23, %v2414_v25  ;;  %v2801_v31 = vadd.f32 %v2800_v24, %v2542_v26  ;;  %v1478_v32 = vpop.f32.mrb[29].mxu0  ;;  %v1990_v33 = vpop.f32.mrb[29].mxu1  ;;  %v1999_v34 = vadd.f32 %v3573_v28, %v4302_v48  ;;  %v1487_v45 = vadd.f32 %v3445_v27, %v4302_v48 }
 0x117   :  { %v1479_v35 = vadd.f32 %v4302_v48, %v1478_v32  ;;  %v1991_v36 = vadd.f32 %v4302_v48, %v1990_v33  ;;  %v3446_v37 = vpop.f32.mrb[30].mxu0  ;;  %v3574_v38 = vpop.f32.mrb[30].mxu1 }
 0x118   :  { %v2678_v41 = vadd.f32 %v2677_v30, %v2415_v29  ;;  %v2802_v42 = vadd.f32 %v2801_v31, %v2543_v20  ;;  %v1481_v43 = vpop.f32.mrb[31].mxu0  ;;  %v1993_v44 = vpop.f32.mrb[31].mxu1  ;;  %v2547_v53 = vmax.f32 %v1999_v34, 0.0  ;;  %v1490_v54 = vadd.f32 %v3446_v37, %v4302_v48 }
 0x119   :  { %v2417_v46 = vmax.f32 %v1479_v35, 0.0  ;;  %v2545_v47 = vmax.f32 %v1991_v36, 0.0  ;;  %v1482_v51 = vadd.f32 %v4302_v48, %v1481_v43  ;;  %v1994_v52 = vadd.f32 %v4302_v48, %v1993_v44 }
 0x11a   :  { %v2679_v49 = vadd.f32 %v2678_v41, %v2416_v39  ;;  %v2803_v50 = vadd.f32 %v2802_v42, %v2544_v40  ;;  %v2002_v55 = vadd.f32 %v3574_v38, %v4302_v48  ;;  %v2419_v62 = vmax.f32 %v1487_v45, 0.0 }
 0x11b   :  { %v2418_v58 = vmax.f32 %v1482_v51, 0.0  ;;  %v2546_v59 = vmax.f32 %v1994_v52, 0.0  ;;  %v2420_v8 = vmax.f32 %v1490_v54, 0.0 }
 0x11c   :  { %v2680_v56 = vadd.f32 %v2679_v49, %v2417_v46  ;;  %v2804_v57 = vadd.f32 %v2803_v50, %v2545_v47  ;;  %v2548_v9 = vmax.f32 %v2002_v55, 0.0 }
 0x11d   :  { %v3449_v60 = vpop.f32.mrb[32].mxu0  ;;  %v3577_v61 = vpop.f32.mrb[32].mxu1 }
 0x11e   :  { %v2681_v63 = vadd.f32 %v2680_v56, %v2418_v58  ;;  %v2805_v0 = vadd.f32 %v2804_v57, %v2546_v59  ;;  %v1494_v1 = vpop.f32.mrb[33].mxu0  ;;  %v2006_v2 = vpop.f32.mrb[33].mxu1  ;;  %v2015_v3 = vadd.f32 %v3577_v61, %v4302_v48  ;;  %v1503_v14 = vadd.f32 %v3449_v60, %v4302_v48 }
 0x11f   :  { %v1495_v4 = vadd.f32 %v4302_v48, %v1494_v1  ;;  %v2007_v5 = vadd.f32 %v4302_v48, %v2006_v2  ;;  %v3450_v6 = vpop.f32.mrb[34].mxu0  ;;  %v3578_v7 = vpop.f32.mrb[34].mxu1 }
 0x120   :  { %v2682_v10 = vadd.f32 %v2681_v63, %v2419_v62  ;;  %v2806_v11 = vadd.f32 %v2805_v0, %v2547_v53  ;;  %v1497_v12 = vpop.f32.mrb[35].mxu0  ;;  %v2009_v13 = vpop.f32.mrb[35].mxu1  ;;  %v2551_v20 = vmax.f32 %v2015_v3, 0.0  ;;  %v1506_v22 = vadd.f32 %v3450_v6, %v4302_v48 }
 0x121   :  { %v2549_v15 = vmax.f32 %v2007_v5, 0.0  ;;  %v1498_v18 = vadd.f32 %v4302_v48, %v1497_v12  ;;  %v2010_v19 = vadd.f32 %v4302_v48, %v2009_v13  ;;  %v2421_v21 = vmax.f32 %v1495_v4, 0.0 }
 0x122   :  { %v4444_v16 = vadd.f32 %v2682_v10, %v2420_v8  ;;  %v4446_v17 = vadd.f32 %v2806_v11, %v2548_v9  ;;  %v2018_v23 = vadd.f32 %v3578_v7, %v4302_v48  ;;  %v2423_v28 = vmax.f32 %v1503_v14, 0.0 }
 0x123   :  { %v2422_v24 = vmax.f32 %v1498_v18, 0.0  ;;  %v2550_v25 = vmax.f32 %v2010_v19, 0.0  ;;  %v2424_v37 = vmax.f32 %v1506_v22, 0.0 }
 0x124   :  { %v2552_v38 = vmax.f32 %v2018_v23, 0.0 }
 0x125   :  { %v3453_v26 = vpop.f32.mrb[36].mxu0  ;;  %v3581_v27 = vpop.f32.mrb[36].mxu1  ;;  %v2684_v29 = vadd.f32 %v2422_v24, %v2421_v21  ;;  %v2808_v30 = vadd.f32 %v2550_v25, %v2549_v15 }
 0x126   :  { %v1510_v31 = vpop.f32.mrb[37].mxu0  ;;  %v2022_v32 = vpop.f32.mrb[37].mxu1  ;;  %v2031_v43 = vadd.f32 %v3581_v27, %v4302_v48  ;;  %v1519_v46 = vadd.f32 %v3453_v26, %v4302_v48 }
 0x127   :  { %v1511_v33 = vadd.f32 %v4302_v48, %v1510_v31  ;;  %v2023_v34 = vadd.f32 %v4302_v48, %v2022_v32  ;;  %v3454_v35 = vpop.f32.mrb[38].mxu0  ;;  %v3582_v36 = vpop.f32.mrb[38].mxu1  ;;  %v2685_v39 = vadd.f32 %v2684_v29, %v2423_v28  ;;  %v2809_v40 = vadd.f32 %v2808_v30, %v2551_v20 }
 0x128   :  { %v1513_v41 = vpop.f32.mrb[39].mxu0  ;;  %v2025_v42 = vpop.f32.mrb[39].mxu1  ;;  %v1522_v54 = vadd.f32 %v3454_v35, %v4302_v48  ;;  %v2034_v55 = vadd.f32 %v3582_v36, %v4302_v48  ;;  %v2555_v56 = vmax.f32 %v2031_v43, 0.0  ;;  %v2427_v61 = vmax.f32 %v1519_v46, 0.0 }
 0x129   :  { %v2425_v44 = vmax.f32 %v1511_v33, 0.0  ;;  %v2553_v45 = vmax.f32 %v2023_v34, 0.0  ;;  %v2686_v47 = vadd.f32 %v2685_v39, %v2424_v37  ;;  %v2810_v49 = vadd.f32 %v2809_v40, %v2552_v38 }
 0x12a   :  { %v1514_v50 = vadd.f32 %v4302_v48, %v1513_v41  ;;  %v2026_v51 = vadd.f32 %v4302_v48, %v2025_v42  ;;  %v2428_v6 = vmax.f32 %v1522_v54, 0.0  ;;  %v2556_v7 = vmax.f32 %v2034_v55, 0.0 }
 0x12b   :  { %v2687_v52 = vadd.f32 %v2686_v47, %v2425_v44  ;;  %v2811_v53 = vadd.f32 %v2810_v49, %v2553_v45 }
 0x12c   :  { %v2426_v57 = vmax.f32 %v1514_v50, 0.0  ;;  %v2554_v58 = vmax.f32 %v2026_v51, 0.0 }
 0x12d   :  { %v3457_v59 = vpop.f32.mrb[40].mxu0  ;;  %v3585_v60 = vpop.f32.mrb[40].mxu1 }
 0x12e   :  { %v1526_v62 = vpop.f32.mrb[41].mxu0  ;;  %v2038_v63 = vpop.f32.mrb[41].mxu1  ;;  %v2688_v0 = vadd.f32 %v2687_v52, %v2426_v57  ;;  %v2812_v1 = vadd.f32 %v2811_v53, %v2554_v58  ;;  %v2047_v8 = vadd.f32 %v3585_v60, %v4302_v48  ;;  %v1535_v15 = vadd.f32 %v3457_v59, %v4302_v48 }
 0x12f   :  { %v1527_v2 = vadd.f32 %v4302_v48, %v1526_v62  ;;  %v2039_v3 = vadd.f32 %v4302_v48, %v2038_v63  ;;  %v3458_v4 = vpop.f32.mrb[42].mxu0  ;;  %v3586_v5 = vpop.f32.mrb[42].mxu1 }
 0x130   :  { %v1529_v9 = vpop.f32.mrb[43].mxu0  ;;  %v2041_v10 = vpop.f32.mrb[43].mxu1  ;;  %v2689_v11 = vadd.f32 %v2688_v0, %v2427_v61  ;;  %v2813_v12 = vadd.f32 %v2812_v1, %v2555_v56  ;;  %v1538_v22 = vadd.f32 %v3458_v4, %v4302_v48  ;;  %v2050_v23 = vadd.f32 %v3586_v5, %v4302_v48 }
 0x131   :  { %v2429_v13 = vmax.f32 %v1527_v2, 0.0  ;;  %v2557_v14 = vmax.f32 %v2039_v3, 0.0  ;;  %v1530_v18 = vadd.f32 %v4302_v48, %v1529_v9  ;;  %v2042_v19 = vadd.f32 %v4302_v48, %v2041_v10 }
 0x132   :  { %v2690_v20 = vadd.f32 %v2689_v11, %v2428_v6  ;;  %v2814_v21 = vadd.f32 %v2813_v12, %v2556_v7  ;;  %v2559_v26 = vmax.f32 %v2047_v8, 0.0  ;;  %v2431_v31 = vmax.f32 %v1535_v15, 0.0 }
 0x133   :  { %v2430_v24 = vmax.f32 %v1530_v18, 0.0  ;;  %v2558_v25 = vmax.f32 %v2042_v19, 0.0  ;;  %v2432_v40 = vmax.f32 %v1538_v22, 0.0  ;;  %v2560_v41 = vmax.f32 %v2050_v23, 0.0 }
 0x134   :  { %v2691_v27 = vadd.f32 %v2690_v20, %v2429_v13  ;;  %v2815_v28 = vadd.f32 %v2814_v21, %v2557_v14 }
 0x135   :  { %v3461_v29 = vpop.f32.mrb[44].mxu0  ;;  %v3589_v30 = vpop.f32.mrb[44].mxu1 }
 0x136   :  { %v1542_v32 = vpop.f32.mrb[45].mxu0  ;;  %v2054_v33 = vpop.f32.mrb[45].mxu1  ;;  %v2692_v34 = vadd.f32 %v2691_v27, %v2430_v24  ;;  %v2816_v35 = vadd.f32 %v2815_v28, %v2558_v25  ;;  %v2063_v42 = vadd.f32 %v3589_v30, %v4302_v48  ;;  %v1551_v50 = vadd.f32 %v3461_v29, %v4302_v48 }
 0x137   :  { %v1543_v36 = vadd.f32 %v4302_v48, %v1542_v32  ;;  %v2055_v37 = vadd.f32 %v4302_v48, %v2054_v33  ;;  %v3462_v38 = vpop.f32.mrb[46].mxu0  ;;  %v3590_v39 = vpop.f32.mrb[46].mxu1 }
 0x138   :  { %v1545_v43 = vpop.f32.mrb[47].mxu0  ;;  %v2057_v44 = vpop.f32.mrb[47].mxu1  ;;  %v2693_v45 = vadd.f32 %v2692_v34, %v2431_v31  ;;  %v2817_v46 = vadd.f32 %v2816_v35, %v2559_v26  ;;  %v1554_v55 = vadd.f32 %v3462_v38, %v4302_v48  ;;  %v2066_v56 = vadd.f32 %v3590_v39, %v4302_v48 }
 0x139   :  { %v2433_v47 = vmax.f32 %v1543_v36, 0.0  ;;  %v2561_v49 = vmax.f32 %v2055_v37, 0.0  ;;  %v1546_v51 = vadd.f32 %v4302_v48, %v1545_v43  ;;  %v2058_v52 = vadd.f32 %v4302_v48, %v2057_v44 }
 0x13a   :  { %v2694_v53 = vadd.f32 %v2693_v45, %v2432_v40  ;;  %v2818_v54 = vadd.f32 %v2817_v46, %v2560_v41  ;;  %v2563_v59 = vmax.f32 %v2063_v42, 0.0  ;;  %v2435_v0 = vmax.f32 %v1551_v50, 0.0 }
 0x13b   :  { %v2434_v57 = vmax.f32 %v1546_v51, 0.0  ;;  %v2562_v58 = vmax.f32 %v2058_v52, 0.0  ;;  %v2436_v9 = vmax.f32 %v1554_v55, 0.0  ;;  %v2564_v10 = vmax.f32 %v2066_v56, 0.0 }
 0x13c   :  { %v2695_v60 = vadd.f32 %v2694_v53, %v2433_v47  ;;  %v2819_v61 = vadd.f32 %v2818_v54, %v2561_v49 }
 0x13d   :  { %v3465_v62 = vpop.f32.mrb[48].mxu0  ;;  %v3593_v63 = vpop.f32.mrb[48].mxu1 }
 0x13e   :  { %v1558_v1 = vpop.f32.mrb[49].mxu0  ;;  %v2070_v2 = vpop.f32.mrb[49].mxu1  ;;  %v2696_v3 = vadd.f32 %v2695_v60, %v2434_v57  ;;  %v2820_v4 = vadd.f32 %v2819_v61, %v2562_v58  ;;  %v2079_v11 = vadd.f32 %v3593_v63, %v4302_v48  ;;  %v1567_v20 = vadd.f32 %v3465_v62, %v4302_v48 }
 0x13f   :  { %v1559_v5 = vadd.f32 %v4302_v48, %v1558_v1  ;;  %v2071_v6 = vadd.f32 %v4302_v48, %v2070_v2  ;;  %v3466_v7 = vpop.f32.mrb[50].mxu0  ;;  %v3594_v8 = vpop.f32.mrb[50].mxu1 }
 0x140   :  { %v1561_v12 = vpop.f32.mrb[51].mxu0  ;;  %v2073_v13 = vpop.f32.mrb[51].mxu1  ;;  %v2697_v14 = vadd.f32 %v2696_v3, %v2435_v0  ;;  %v2821_v15 = vadd.f32 %v2820_v4, %v2563_v59  ;;  %v1570_v25 = vadd.f32 %v3466_v7, %v4302_v48  ;;  %v2082_v26 = vadd.f32 %v3594_v8, %v4302_v48 }
 0x141   :  { %v2437_v18 = vmax.f32 %v1559_v5, 0.0  ;;  %v2565_v19 = vmax.f32 %v2071_v6, 0.0  ;;  %v1562_v21 = vadd.f32 %v4302_v48, %v1561_v12  ;;  %v2074_v22 = vadd.f32 %v4302_v48, %v2073_v13 }
 0x142   :  { %v2698_v23 = vadd.f32 %v2697_v14, %v2436_v9  ;;  %v2822_v24 = vadd.f32 %v2821_v15, %v2564_v10  ;;  %v2567_v29 = vmax.f32 %v2079_v11, 0.0  ;;  %v2439_v34 = vmax.f32 %v1567_v20, 0.0 }
 0x143   :  { %v2438_v27 = vmax.f32 %v1562_v21, 0.0  ;;  %v2566_v28 = vmax.f32 %v2074_v22, 0.0  ;;  %v2440_v43 = vmax.f32 %v1570_v25, 0.0  ;;  %v2568_v44 = vmax.f32 %v2082_v26, 0.0 }
 0x144   :  { %v2699_v30 = vadd.f32 %v2698_v23, %v2437_v18  ;;  %v2823_v31 = vadd.f32 %v2822_v24, %v2565_v19 }
 0x145   :  { %v3469_v32 = vpop.f32.mrb[52].mxu0  ;;  %v3597_v33 = vpop.f32.mrb[52].mxu1 }
 0x146   :  { %v1574_v35 = vpop.f32.mrb[53].mxu0  ;;  %v2086_v36 = vpop.f32.mrb[53].mxu1  ;;  %v2700_v37 = vadd.f32 %v2699_v30, %v2438_v27  ;;  %v2824_v38 = vadd.f32 %v2823_v31, %v2566_v28  ;;  %v2095_v45 = vadd.f32 %v3597_v33, %v4302_v48  ;;  %v1583_v53 = vadd.f32 %v3469_v32, %v4302_v48 }
 0x147   :  { %v1575_v39 = vadd.f32 %v4302_v48, %v1574_v35  ;;  %v2087_v40 = vadd.f32 %v4302_v48, %v2086_v36  ;;  %v3470_v41 = vpop.f32.mrb[54].mxu0  ;;  %v3598_v42 = vpop.f32.mrb[54].mxu1 }
 0x148   :  { %v1577_v46 = vpop.f32.mrb[55].mxu0  ;;  %v2089_v47 = vpop.f32.mrb[55].mxu1  ;;  %v2701_v49 = vadd.f32 %v2700_v37, %v2439_v34  ;;  %v2825_v50 = vadd.f32 %v2824_v38, %v2567_v29  ;;  %v1586_v58 = vadd.f32 %v3470_v41, %v4302_v48  ;;  %v2098_v59 = vadd.f32 %v3598_v42, %v4302_v48 }
 0x149   :  { %v2441_v51 = vmax.f32 %v1575_v39, 0.0  ;;  %v2569_v52 = vmax.f32 %v2087_v40, 0.0  ;;  %v1578_v54 = vadd.f32 %v4302_v48, %v1577_v46  ;;  %v2090_v55 = vadd.f32 %v4302_v48, %v2089_v47 }
 0x14a   :  { %v2702_v56 = vadd.f32 %v2701_v49, %v2440_v43  ;;  %v2826_v57 = vadd.f32 %v2825_v50, %v2568_v44  ;;  %v2571_v62 = vmax.f32 %v2095_v45, 0.0  ;;  %v2443_v3 = vmax.f32 %v1583_v53, 0.0  ;;  %v4504_v43 = vld [vmem:[%s4665_s2] ss:$0 sm:$0xff] }
 0x14b   :  { %v2442_v60 = vmax.f32 %v1578_v54, 0.0  ;;  %v2570_v61 = vmax.f32 %v2090_v55, 0.0  ;;  %v2444_v12 = vmax.f32 %v1586_v58, 0.0  ;;  %v2572_v13 = vmax.f32 %v2098_v59, 0.0 }
 0x14c   :  { %v2703_v63 = vadd.f32 %v2702_v56, %v2441_v51  ;;  %v2827_v0 = vadd.f32 %v2826_v57, %v2569_v52  ;;  %v2928_v47 = vrot.slane %v4444_v16, 4 }
 0x14d   :  { %v3473_v1 = vpop.f32.mrb[56].mxu0  ;;  %v3601_v2 = vpop.f32.mrb[56].mxu1 }
 0x14e   :  { %v1590_v4 = vpop.f32.mrb[57].mxu0  ;;  %v2102_v5 = vpop.f32.mrb[57].mxu1  ;;  %v2704_v6 = vadd.f32 %v2703_v63, %v2442_v60  ;;  %v2828_v7 = vadd.f32 %v2827_v0, %v2570_v61  ;;  %v2111_v14 = vadd.f32 %v3601_v2, %v4302_v48  ;;  %v1599_v23 = vadd.f32 %v3473_v1, %v4302_v48 }
 0x14f   :  { %v1591_v8 = vadd.f32 %v4302_v48, %v1590_v4  ;;  %v2103_v9 = vadd.f32 %v4302_v48, %v2102_v5  ;;  %v3474_v10 = vpop.f32.mrb[58].mxu0  ;;  %v3602_v11 = vpop.f32.mrb[58].mxu1 }
 0x150   :  { %v1593_v15 = vpop.f32.mrb[59].mxu0  ;;  %v2105_v18 = vpop.f32.mrb[59].mxu1  ;;  %v2705_v19 = vadd.f32 %v2704_v6, %v2443_v3  ;;  %v2829_v20 = vadd.f32 %v2828_v7, %v2571_v62  ;;  %v1602_v28 = vadd.f32 %v3474_v10, %v4302_v48  ;;  %v2114_v29 = vadd.f32 %v3602_v11, %v4302_v48 }
 0x151   :  { %v2445_v21 = vmax.f32 %v1591_v8, 0.0  ;;  %v2573_v22 = vmax.f32 %v2103_v9, 0.0  ;;  %v1594_v24 = vadd.f32 %v4302_v48, %v1593_v15  ;;  %v2106_v25 = vadd.f32 %v4302_v48, %v2105_v18 }
 0x152   :  { %v2706_v26 = vadd.f32 %v2705_v19, %v2444_v12  ;;  %v2830_v27 = vadd.f32 %v2829_v20, %v2572_v13  ;;  %v2575_v32 = vmax.f32 %v2111_v14, 0.0  ;;  %v2447_v37 = vmax.f32 %v1599_v23, 0.0 }
 0x153   :  { %v2446_v30 = vmax.f32 %v1594_v24, 0.0  ;;  %v2574_v31 = vmax.f32 %v2106_v25, 0.0  ;;  %v2448_v49 = vmax.f32 %v1602_v28, 0.0  ;;  %v2576_v50 = vmax.f32 %v2114_v29, 0.0 }
 0x154   :  { %v2707_v33 = vadd.f32 %v2706_v26, %v2445_v21  ;;  %v2831_v34 = vadd.f32 %v2830_v27, %v2573_v22  ;;  %v2929_v62 = vadd.f32 %v2928_v47, %v4444_v16 }
 0x155   :  { %v3477_v35 = vpop.f32.mrb[60].mxu0  ;;  %v3605_v36 = vpop.f32.mrb[60].mxu1 }
 0x156   :  { %v1606_v38 = vpop.f32.mrb[61].mxu0  ;;  %v2118_v39 = vpop.f32.mrb[61].mxu1  ;;  %v2708_v40 = vadd.f32 %v2707_v33, %v2446_v30  ;;  %v2832_v41 = vadd.f32 %v2831_v34, %v2574_v31  ;;  %v2127_v51 = vadd.f32 %v4504_v43, %v3605_v36  ;;  %v1615_v57 = vadd.f32 %v4504_v43, %v3477_v35 }
 0x157   :  { %v1607_v42 = vadd.f32 %v4302_v48, %v1606_v38  ;;  %v2119_v44 = vadd.f32 %v4504_v43, %v2118_v39  ;;  %v3478_v45 = vpop.f32.mrb[62].mxu0  ;;  %v3606_v46 = vpop.f32.mrb[62].mxu1  ;;  %v2930_v18 = vrot.slane %v2929_v62, 2 }
 0x158   :  { %v1609_v52 = vpop.f32.mrb[63].mxu0  ;;  %v2121_v53 = vpop.f32.mrb[63].mxu1  ;;  %v2709_v54 = vadd.f32 %v2708_v40, %v2447_v37  ;;  %v2833_v55 = vadd.f32 %v2832_v41, %v2575_v32  ;;  %v2579_v63 = vmax.f32 %v2127_v51, 0.0  ;;  %v1618_v4 = vadd.f32 %v4504_v43, %v3478_v45 }
 0x159   :  { %v2449_v48 = vmax.f32 %v1607_v42, 0.0  ;;  %v2577_v56 = vmax.f32 %v2119_v44, 0.0  ;;  %v1610_v58 = vadd.f32 %v4504_v43, %v1609_v52  ;;  %v2122_v59 = vadd.f32 %v4504_v43, %v2121_v53 }
 0x15a   :  { %v2710_v60 = vadd.f32 %v2709_v54, %v2448_v49  ;;  %v2834_v61 = vadd.f32 %v2833_v55, %v2576_v50  ;;  %v2130_v5 = vadd.f32 %v4504_v43, %v3606_v46  ;;  %v2451_v8 = vmax.f32 %v1615_v57, 0.0 }
 0x15b   :  { %v2450_v0 = vmax.f32 %v1610_v58, 0.0  ;;  %v2578_v1 = vmax.f32 %v2122_v59, 0.0  ;;  %v2452_v22 = vmax.f32 %v1618_v4, 0.0  ;;  %v2931_v41 = vadd.f32 %v2930_v18, %v2929_v62 }
 0x15c   :  { %v2711_v2 = vadd.f32 %v2710_v60, %v2449_v48  ;;  %v2835_v3 = vadd.f32 %v2834_v61, %v2577_v56  ;;  %v2580_v23 = vmax.f32 %v2130_v5, 0.0 }
 0x15d   :  { %v3481_v6 = vpop.f32.mrb[64].mxu0  ;;  %v3609_v7 = vpop.f32.mrb[64].mxu1 }
 0x15e   :  { %v1622_v9 = vpop.f32.mrb[65].mxu0  ;;  %v2134_v10 = vpop.f32.mrb[65].mxu1  ;;  %v2712_v11 = vadd.f32 %v2711_v2, %v2450_v0  ;;  %v2836_v12 = vadd.f32 %v2835_v3, %v2578_v1  ;;  %v2143_v13 = vadd.f32 %v4504_v43, %v3609_v7  ;;  %v1631_v26 = vadd.f32 %v4504_v43, %v3481_v6 }
 0x15f   :  { %v2135_v16 = vadd.f32 %v4504_v43, %v2134_v10  ;;  %v3482_v14 = vpop.f32.mrb[66].mxu0  ;;  %v3610_v15 = vpop.f32.mrb[66].mxu1  ;;  %v1623_v19 = vadd.f32 %v4504_v43, %v1622_v9 }
 0x160   :  { %v1625_v20 = vpop.f32.mrb[67].mxu0  ;;  %v2137_v21 = vpop.f32.mrb[67].mxu1  ;;  %v2713_v24 = vadd.f32 %v2712_v11, %v2451_v8  ;;  %v2837_v25 = vadd.f32 %v2836_v12, %v2579_v63  ;;  %v2583_v32 = vmax.f32 %v2143_v13, 0.0  ;;  %v1634_v33 = vadd.f32 %v4504_v43, %v3482_v14 }
 0x161   :  { %v2581_v27 = vmax.f32 %v2135_v16, 0.0  ;;  %v1626_v28 = vadd.f32 %v4504_v43, %v1625_v20  ;;  %v2138_v29 = vadd.f32 %v4504_v43, %v2137_v21  ;;  %v2453_v34 = vmax.f32 %v1623_v19, 0.0 }
 0x162   :  { %v2714_v30 = vadd.f32 %v2713_v24, %v2452_v22  ;;  %v4521_v31 = vadd.f32 %v2837_v25, %v2580_v23  ;;  %v2146_v35 = vadd.f32 %v4504_v43, %v3610_v15  ;;  %v2455_v42 = vmax.f32 %v1631_v26, 0.0 }
 0x163   :  { %v2454_v36 = vmax.f32 %v1626_v28, 0.0  ;;  %v2582_v37 = vmax.f32 %v2138_v29, 0.0  ;;  %v2456_v54 = vmax.f32 %v1634_v33, 0.0  ;;  %v2932_v63 = vrot.slane %v2931_v41, 1 }
 0x164   :  { %v2934_v38 = vrot.slane %v2714_v30, 4  ;;  %v2584_v55 = vmax.f32 %v2146_v35, 0.0 }
 0x165   :  { %v3485_v39 = vpop.f32.mrb[68].mxu0  ;;  %v3613_v40 = vpop.f32.mrb[68].mxu1  ;;  %v2715_v44 = vadd.f32 %v2454_v36, %v2453_v34  ;;  %v2839_v45 = vadd.f32 %v2582_v37, %v2581_v27  ;;  %v2933_v15 = vadd.f32 %v2932_v63, %v2931_v41 }
 0x166   :  { %v1638_v46 = vpop.f32.mrb[69].mxu0  ;;  %v2150_v47 = vpop.f32.mrb[69].mxu1  ;;  %v2935_v49 = vadd.f32 %v2934_v38, %v2714_v30  ;;  %v2159_v60 = vadd.f32 %v4504_v43, %v3613_v40  ;;  %v1647_v0 = vadd.f32 %v4504_v43, %v3485_v39 }
 0x167   :  { %v1639_v50 = vadd.f32 %v4504_v43, %v1638_v46  ;;  %v2151_v51 = vadd.f32 %v4504_v43, %v2150_v47  ;;  %v3486_v52 = vpop.f32.mrb[70].mxu0  ;;  %v3614_v53 = vpop.f32.mrb[70].mxu1  ;;  %v2716_v48 = vadd.f32 %v2715_v44, %v2455_v42  ;;  %v2840_v56 = vadd.f32 %v2839_v45, %v2583_v32 }
 0x168   :  { %v1641_v57 = vpop.f32.mrb[71].mxu0  ;;  %v2153_v58 = vpop.f32.mrb[71].mxu1  ;;  %v2936_v59 = vrot.slane %v2935_v49, 2  ;;  %v1650_v8 = vadd.f32 %v4504_v43, %v3486_v52  ;;  %v2162_v9 = vadd.f32 %v4504_v43, %v3614_v53  ;;  %v2587_v11 = vmax.f32 %v2159_v60, 0.0 }
 0x169   :  { %v2457_v61 = vmax.f32 %v1639_v50, 0.0  ;;  %v2585_v62 = vmax.f32 %v2151_v51, 0.0  ;;  %v2717_v1 = vadd.f32 %v2716_v48, %v2456_v54  ;;  %v2841_v2 = vadd.f32 %v2840_v56, %v2584_v55 }
 0x16a   :  { %v2937_v3 = vadd.f32 %v2936_v59, %v2935_v49  ;;  %v1642_v4 = vadd.f32 %v4504_v43, %v1641_v57  ;;  %v2154_v5 = vadd.f32 %v4504_v43, %v2153_v58  ;;  %v2459_v18 = vmax.f32 %v1647_v0, 0.0 }
 0x16b   :  { %v2718_v6 = vadd.f32 %v2717_v1, %v2457_v61  ;;  %v2842_v7 = vadd.f32 %v2841_v2, %v2585_v62  ;;  %v2460_v27 = vmax.f32 %v1650_v8, 0.0  ;;  %v2588_v28 = vmax.f32 %v2162_v9, 0.0 }
 0x16c   :  { %v2938_v10 = vrot.slane %v2937_v3, 1  ;;  %v2458_v12 = vmax.f32 %v1642_v4, 0.0  ;;  %v2586_v13 = vmax.f32 %v2154_v5, 0.0  ;;  %v2976_v38 = vmul.f32 0.00390625, %v2933_v15 }
 0x16d   :  { %v3489_v16 = vpop.f32.mrb[72].mxu0  ;;  %v3617_v14 = vpop.f32.mrb[72].mxu1 }
 0x16e   :  { %v1654_v19 = vpop.f32.mrb[73].mxu0  ;;  %v2166_v20 = vpop.f32.mrb[73].mxu1  ;;  %v2939_v21 = vadd.f32 %v2938_v10, %v2937_v3  ;;  %v2719_v22 = vadd.f32 %v2718_v6, %v2458_v12  ;;  %v2843_v23 = vadd.f32 %v2842_v7, %v2586_v13  ;;  %v2175_v29 = vadd.f32 %v4504_v43, %v3617_v14 }
 0x16f   :  { %v1655_v24 = vadd.f32 %v4504_v43, %v1654_v19  ;;  %v3490_v25 = vpop.f32.mrb[74].mxu0  ;;  %v3618_v26 = vpop.f32.mrb[74].mxu1  ;;  %v2167_v30 = vadd.f32 %v4504_v43, %v2166_v20  ;;  %v1663_v39 = vadd.f32 %v4504_v43, %v3489_v16 }
 0x170   :  { %v1657_v32 = vpop.f32.mrb[75].mxu0  ;;  %v2169_v33 = vpop.f32.mrb[75].mxu1  ;;  %v2977_v34 = vmul.f32 0.00390625, %v2939_v21  ;;  %v2720_v35 = vadd.f32 %v2719_v22, %v2459_v18  ;;  %v2844_v36 = vadd.f32 %v2843_v23, %v2587_v11  ;;  %v1666_v46 = vadd.f32 %v4504_v43, %v3490_v25 }
 0x171   :  { %v2461_v37 = vmax.f32 %v1655_v24, 0.0  ;;  %v2589_v40 = vmax.f32 %v2167_v30, 0.0  ;;  %v1658_v41 = vadd.f32 %v4504_v43, %v1657_v32  ;;  %v2170_v45 = vadd.f32 %v4504_v43, %v2169_v33 }
 0x172   :  { %v2721_v42 = vadd.f32 %v2720_v35, %v2460_v27  ;;  %v2845_v44 = vadd.f32 %v2844_v36, %v2588_v28  ;;  %v2178_v47 = vadd.f32 %v4504_v43, %v3618_v26  ;;  %v4542_v50 = vsel %vm2992_vm1, %v2977_v34, %v2976_v38 }
 0x173   :  { %v2462_v49 = vmax.f32 %v1658_v41, 0.0  ;;  %v2591_v51 = vmax.f32 %v2175_v29, 0.0  ;;  %v2590_v54 = vmax.f32 %v2170_v45, 0.0  ;;  %v2463_v56 = vmax.f32 %v1663_v39, 0.0 }
 0x174   :  { %v2722_v52 = vadd.f32 %v2721_v42, %v2461_v37  ;;  %v2846_v53 = vadd.f32 %v2845_v44, %v2589_v40  ;;  %v2464_v1 = vmax.f32 %v1666_v46, 0.0  ;;  %v2592_v2 = vmax.f32 %v2178_v47, 0.0 }
 0x175   :  { %v3493_v55 = vpop.f32.mrb[76].mxu0  ;;  %v3621_v48 = vpop.f32.mrb[76].mxu1 }
 0x176   :  { %v1670_v57 = vpop.f32.mrb[77].mxu0  ;;  %v2182_v58 = vpop.f32.mrb[77].mxu1  ;;  %v2723_v59 = vadd.f32 %v2722_v52, %v2462_v49  ;;  %v2847_v60 = vadd.f32 %v2846_v53, %v2590_v54  ;;  %v2191_v3 = vadd.f32 %v4504_v43, %v3621_v48  ;;  %v1679_v10 = vadd.f32 %v4504_v43, %v3493_v55 }
 0x177   :  { %v1671_v61 = vadd.f32 %v4504_v43, %v1670_v57  ;;  %v2183_v62 = vadd.f32 %v4504_v43, %v2182_v58  ;;  %v3494_v63 = vpop.f32.mrb[78].mxu0  ;;  %v3622_v0 = vpop.f32.mrb[78].mxu1 }
 0x178   :  { %v1673_v4 = vpop.f32.mrb[79].mxu0  ;;  %v2185_v5 = vpop.f32.mrb[79].mxu1  ;;  %v2724_v6 = vadd.f32 %v2723_v59, %v2463_v56  ;;  %v2848_v7 = vadd.f32 %v2847_v60, %v2591_v51  ;;  %v1682_v14 = vadd.f32 %v4504_v43, %v3494_v63  ;;  %v2194_v15 = vadd.f32 %v4504_v43, %v3622_v0 }
 0x179   :  { %v2465_v8 = vmax.f32 %v1671_v61, 0.0  ;;  %v2593_v9 = vmax.f32 %v2183_v62, 0.0  ;;  %v1674_v11 = vadd.f32 %v4504_v43, %v1673_v4  ;;  %v2186_v12 = vadd.f32 %v4504_v43, %v2185_v5 }
 0x17a   :  { %v2725_v13 = vadd.f32 %v2724_v6, %v2464_v1  ;;  %v2849_v16 = vadd.f32 %v2848_v7, %v2592_v2  ;;  %v2595_v20 = vmax.f32 %v2191_v3, 0.0  ;;  %v2467_v25 = vmax.f32 %v1679_v10, 0.0 }
 0x17b   :  { %v2466_v18 = vmax.f32 %v1674_v11, 0.0  ;;  %v2594_v19 = vmax.f32 %v2186_v12, 0.0  ;;  %v2468_v35 = vmax.f32 %v1682_v14, 0.0  ;;  %v2596_v36 = vmax.f32 %v2194_v15, 0.0 }
 0x17c   :  { %v2726_v21 = vadd.f32 %v2725_v13, %v2465_v8  ;;  %v2850_v22 = vadd.f32 %v2849_v16, %v2593_v9 }
 0x17d   :  { %v3497_v23 = vpop.f32.mrb[80].mxu0  ;;  %v3625_v24 = vpop.f32.mrb[80].mxu1 }
 0x17e   :  { %v1686_v26 = vpop.f32.mrb[81].mxu0  ;;  %v2198_v27 = vpop.f32.mrb[81].mxu1  ;;  %v2727_v28 = vadd.f32 %v2726_v21, %v2466_v18  ;;  %v2851_v29 = vadd.f32 %v2850_v22, %v2594_v19  ;;  %v2207_v37 = vadd.f32 %v4504_v43, %v3625_v24  ;;  %v1695_v45 = vadd.f32 %v4504_v43, %v3497_v23 }
 0x17f   :  { %v1687_v30 = vadd.f32 %v4504_v43, %v1686_v26  ;;  %v2199_v32 = vadd.f32 %v4504_v43, %v2198_v27  ;;  %v3498_v33 = vpop.f32.mrb[82].mxu0  ;;  %v3626_v34 = vpop.f32.mrb[82].mxu1 }
 0x180   :  { %v1689_v38 = vpop.f32.mrb[83].mxu0  ;;  %v2201_v39 = vpop.f32.mrb[83].mxu1  ;;  %v2728_v40 = vadd.f32 %v2727_v28, %v2467_v25  ;;  %v2852_v41 = vadd.f32 %v2851_v29, %v2595_v20  ;;  %v1698_v52 = vadd.f32 %v4504_v43, %v3498_v33  ;;  %v2210_v53 = vadd.f32 %v4504_v43, %v3626_v34 }
 0x181   :  { %v2469_v42 = vmax.f32 %v1687_v30, 0.0  ;;  %v2597_v44 = vmax.f32 %v2199_v32, 0.0  ;;  %v1690_v46 = vadd.f32 %v4504_v43, %v1689_v38  ;;  %v2202_v47 = vadd.f32 %v4504_v43, %v2201_v39 }
 0x182   :  { %v2729_v49 = vadd.f32 %v2728_v40, %v2468_v35  ;;  %v2853_v51 = vadd.f32 %v2852_v41, %v2596_v36  ;;  %v2599_v48 = vmax.f32 %v2207_v37, 0.0  ;;  %v2471_v60 = vmax.f32 %v1695_v45, 0.0 }
 0x183   :  { %v2470_v54 = vmax.f32 %v1690_v46, 0.0  ;;  %v2598_v55 = vmax.f32 %v2202_v47, 0.0  ;;  %v2472_v5 = vmax.f32 %v1698_v52, 0.0  ;;  %v2600_v6 = vmax.f32 %v2210_v53, 0.0 }
 0x184   :  { %v2730_v56 = vadd.f32 %v2729_v49, %v2469_v42  ;;  %v2854_v57 = vadd.f32 %v2853_v51, %v2597_v44 }
 0x185   :  { %v3501_v58 = vpop.f32.mrb[84].mxu0  ;;  %v3629_v59 = vpop.f32.mrb[84].mxu1 }
 0x186   :  { %v1702_v61 = vpop.f32.mrb[85].mxu0  ;;  %v2214_v62 = vpop.f32.mrb[85].mxu1  ;;  %v2731_v63 = vadd.f32 %v2730_v56, %v2470_v54  ;;  %v2855_v0 = vadd.f32 %v2854_v57, %v2598_v55  ;;  %v2223_v7 = vadd.f32 %v4504_v43, %v3629_v59  ;;  %v1711_v16 = vadd.f32 %v4504_v43, %v3501_v58 }
 0x187   :  { %v1703_v1 = vadd.f32 %v4504_v43, %v1702_v61  ;;  %v2215_v2 = vadd.f32 %v4504_v43, %v2214_v62  ;;  %v3502_v3 = vpop.f32.mrb[86].mxu0  ;;  %v3630_v4 = vpop.f32.mrb[86].mxu1 }
 0x188   :  { %v1705_v8 = vpop.f32.mrb[87].mxu0  ;;  %v2217_v9 = vpop.f32.mrb[87].mxu1  ;;  %v2732_v10 = vadd.f32 %v2731_v63, %v2471_v60  ;;  %v2856_v11 = vadd.f32 %v2855_v0, %v2599_v48  ;;  %v1714_v20 = vadd.f32 %v4504_v43, %v3502_v3  ;;  %v2226_v21 = vadd.f32 %v4504_v43, %v3630_v4 }
 0x189   :  { %v2473_v12 = vmax.f32 %v1703_v1, 0.0  ;;  %v2601_v13 = vmax.f32 %v2215_v2, 0.0  ;;  %v1706_v14 = vadd.f32 %v4504_v43, %v1705_v8  ;;  %v2218_v15 = vadd.f32 %v4504_v43, %v2217_v9 }
 0x18a   :  { %v2733_v18 = vadd.f32 %v2732_v10, %v2472_v5  ;;  %v2857_v19 = vadd.f32 %v2856_v11, %v2600_v6  ;;  %v2603_v24 = vmax.f32 %v2223_v7, 0.0  ;;  %v2475_v29 = vmax.f32 %v1711_v16, 0.0 }
 0x18b   :  { %v2474_v22 = vmax.f32 %v1706_v14, 0.0  ;;  %v2602_v23 = vmax.f32 %v2218_v15, 0.0  ;;  %v2476_v39 = vmax.f32 %v1714_v20, 0.0  ;;  %v2604_v40 = vmax.f32 %v2226_v21, 0.0 }
 0x18c   :  { %v2734_v25 = vadd.f32 %v2733_v18, %v2473_v12  ;;  %v2858_v26 = vadd.f32 %v2857_v19, %v2601_v13 }
 0x18d   :  { %v3505_v27 = vpop.f32.mrb[88].mxu0  ;;  %v3633_v28 = vpop.f32.mrb[88].mxu1 }
 0x18e   :  { %v1718_v30 = vpop.f32.mrb[89].mxu0  ;;  %v2230_v32 = vpop.f32.mrb[89].mxu1  ;;  %v2735_v33 = vadd.f32 %v2734_v25, %v2474_v22  ;;  %v2859_v34 = vadd.f32 %v2858_v26, %v2602_v23  ;;  %v2239_v41 = vadd.f32 %v4504_v43, %v3633_v28  ;;  %v1727_v51 = vadd.f32 %v4504_v43, %v3505_v27 }
 0x18f   :  { %v1719_v35 = vadd.f32 %v4504_v43, %v1718_v30  ;;  %v2231_v36 = vadd.f32 %v4504_v43, %v2230_v32  ;;  %v3506_v37 = vpop.f32.mrb[90].mxu0  ;;  %v3634_v38 = vpop.f32.mrb[90].mxu1 }
 0x190   :  { %v1721_v42 = vpop.f32.mrb[91].mxu0  ;;  %v2233_v44 = vpop.f32.mrb[91].mxu1  ;;  %v2736_v45 = vadd.f32 %v2735_v33, %v2475_v29  ;;  %v2860_v46 = vadd.f32 %v2859_v34, %v2603_v24  ;;  %v1730_v48 = vadd.f32 %v4504_v43, %v3506_v37  ;;  %v2242_v56 = vadd.f32 %v4504_v43, %v3634_v38 }
 0x191   :  { %v2477_v47 = vmax.f32 %v1719_v35, 0.0  ;;  %v2605_v49 = vmax.f32 %v2231_v36, 0.0  ;;  %v1722_v52 = vadd.f32 %v4504_v43, %v1721_v42  ;;  %v2234_v53 = vadd.f32 %v4504_v43, %v2233_v44 }
 0x192   :  { %v2737_v54 = vadd.f32 %v2736_v45, %v2476_v39  ;;  %v2861_v55 = vadd.f32 %v2860_v46, %v2604_v40  ;;  %v2607_v59 = vmax.f32 %v2239_v41, 0.0  ;;  %v2479_v0 = vmax.f32 %v1727_v51, 0.0 }
 0x193   :  { %v2478_v57 = vmax.f32 %v1722_v52, 0.0  ;;  %v2606_v58 = vmax.f32 %v2234_v53, 0.0  ;;  %v2480_v9 = vmax.f32 %v1730_v48, 0.0  ;;  %v2608_v10 = vmax.f32 %v2242_v56, 0.0 }
 0x194   :  { %v2738_v60 = vadd.f32 %v2737_v54, %v2477_v47  ;;  %v2862_v61 = vadd.f32 %v2861_v55, %v2605_v49 }
 0x195   :  { %v3509_v62 = vpop.f32.mrb[92].mxu0  ;;  %v3637_v63 = vpop.f32.mrb[92].mxu1 }
 0x196   :  { %v1734_v1 = vpop.f32.mrb[93].mxu0  ;;  %v2246_v2 = vpop.f32.mrb[93].mxu1  ;;  %v2739_v3 = vadd.f32 %v2738_v60, %v2478_v57  ;;  %v2863_v4 = vadd.f32 %v2862_v61, %v2606_v58  ;;  %v2255_v11 = vadd.f32 %v4504_v43, %v3637_v63  ;;  %v1743_v19 = vadd.f32 %v4504_v43, %v3509_v62 }
 0x197   :  { %v1735_v5 = vadd.f32 %v4504_v43, %v1734_v1  ;;  %v2247_v6 = vadd.f32 %v4504_v43, %v2246_v2  ;;  %v3510_v7 = vpop.f32.mrb[94].mxu0  ;;  %v3638_v8 = vpop.f32.mrb[94].mxu1 }
 0x198   :  { %v1737_v12 = vpop.f32.mrb[95].mxu0  ;;  %v2249_v13 = vpop.f32.mrb[95].mxu1  ;;  %v2740_v16 = vadd.f32 %v2739_v3, %v2479_v0  ;;  %v2864_v14 = vadd.f32 %v2863_v4, %v2607_v59  ;;  %v2611_v24 = vmax.f32 %v2255_v11, 0.0  ;;  %v1746_v29 = vadd.f32 %v4504_v43, %v3510_v7 }
 0x199   :  { %v2481_v15 = vmax.f32 %v1735_v5, 0.0  ;;  %v2609_v18 = vmax.f32 %v2247_v6, 0.0  ;;  %v1738_v20 = vadd.f32 %v4504_v43, %v1737_v12  ;;  %v2250_v21 = vadd.f32 %v4504_v43, %v2249_v13 }
 0x19a   :  { %v2741_v22 = vadd.f32 %v2740_v16, %v2480_v9  ;;  %v2865_v23 = vadd.f32 %v2864_v14, %v2608_v10  ;;  %v2258_v30 = vadd.f32 %v4504_v43, %v3638_v8  ;;  %v2483_v34 = vmax.f32 %v1743_v19, 0.0 }
 0x19b   :  { %v2482_v25 = vmax.f32 %v1738_v20, 0.0  ;;  %v2610_v26 = vmax.f32 %v2250_v21, 0.0  ;;  %v2484_v47 = vmax.f32 %v1746_v29, 0.0 }
 0x19c   :  { %v2742_v27 = vadd.f32 %v2741_v22, %v2481_v15  ;;  %v2866_v28 = vadd.f32 %v2865_v23, %v2609_v18  ;;  %v2612_v49 = vmax.f32 %v2258_v30, 0.0 }
 0x19d   :  { %v3513_v32 = vpop.f32.mrb[96].mxu0  ;;  %v3641_v33 = vpop.f32.mrb[96].mxu1 }
 0x19e   :  { %v1750_v35 = vpop.f32.mrb[97].mxu0  ;;  %v2262_v36 = vpop.f32.mrb[97].mxu1  ;;  %v2743_v37 = vadd.f32 %v2742_v27, %v2482_v25  ;;  %v2867_v38 = vadd.f32 %v2866_v28, %v2610_v26  ;;  %v2271_v39 = vadd.f32 %v4504_v43, %v3641_v33  ;;  %v1759_v53 = vadd.f32 %v4504_v43, %v3513_v32 }
 0x19f   :  { %v2263_v40 = vadd.f32 %v4504_v43, %v2262_v36  ;;  %v3514_v41 = vpop.f32.mrb[98].mxu0  ;;  %v3642_v42 = vpop.f32.mrb[98].mxu1  ;;  %v1751_v44 = vadd.f32 %v4504_v43, %v1750_v35 }
 0x1a0   :  { %v1753_v45 = vpop.f32.mrb[99].mxu0  ;;  %v2265_v46 = vpop.f32.mrb[99].mxu1  ;;  %v2744_v51 = vadd.f32 %v2743_v37, %v2483_v34  ;;  %v2868_v52 = vadd.f32 %v2867_v38, %v2611_v24  ;;  %v2615_v58 = vmax.f32 %v2271_v39, 0.0  ;;  %v1762_v59 = vadd.f32 %v4504_v43, %v3514_v41 }
 0x1a1   :  { %v2613_v54 = vmax.f32 %v2263_v40, 0.0  ;;  %v1754_v55 = vadd.f32 %v4504_v43, %v1753_v45  ;;  %v2266_v48 = vadd.f32 %v4504_v43, %v2265_v46  ;;  %v2485_v60 = vmax.f32 %v1751_v44, 0.0 }
 0x1a2   :  { %v2745_v56 = vadd.f32 %v2744_v51, %v2484_v47  ;;  %v4590_v57 = vadd.f32 %v2868_v52, %v2612_v49  ;;  %v2274_v61 = vadd.f32 %v4504_v43, %v3642_v42  ;;  %v2487_v3 = vmax.f32 %v1759_v53, 0.0 }
 0x1a3   :  { %v2486_v62 = vmax.f32 %v1754_v55, 0.0  ;;  %v2614_v63 = vmax.f32 %v2266_v48, 0.0  ;;  %v2488_v13 = vmax.f32 %v1762_v59, 0.0 }
 0x1a4   :  { %v2940_v0 = vrot.slane %v2745_v56, 4  ;;  %v2616_v16 = vmax.f32 %v2274_v61, 0.0 }
 0x1a5   :  { %v3517_v1 = vpop.f32.mrb[100].mxu0  ;;  %v3645_v2 = vpop.f32.mrb[100].mxu1  ;;  %v2746_v4 = vadd.f32 %v2486_v62, %v2485_v60  ;;  %v2870_v5 = vadd.f32 %v2614_v63, %v2613_v54 }
 0x1a6   :  { %v1766_v6 = vpop.f32.mrb[101].mxu0  ;;  %v2278_v7 = vpop.f32.mrb[101].mxu1  ;;  %v2941_v8 = vadd.f32 %v2940_v0, %v2745_v56  ;;  %v2287_v21 = vadd.f32 %v4504_v43, %v3645_v2  ;;  %v1775_v24 = vadd.f32 %v4504_v43, %v3517_v1 }
 0x1a7   :  { %v1767_v9 = vadd.f32 %v4504_v43, %v1766_v6  ;;  %v2279_v10 = vadd.f32 %v4504_v43, %v2278_v7  ;;  %v3518_v11 = vpop.f32.mrb[102].mxu0  ;;  %v3646_v12 = vpop.f32.mrb[102].mxu1  ;;  %v2747_v14 = vadd.f32 %v2746_v4, %v2487_v3  ;;  %v2871_v15 = vadd.f32 %v2870_v5, %v2615_v58 }
 0x1a8   :  { %v1769_v18 = vpop.f32.mrb[103].mxu0  ;;  %v2281_v19 = vpop.f32.mrb[103].mxu1  ;;  %v2942_v20 = vrot.slane %v2941_v8, 2  ;;  %v1778_v33 = vadd.f32 %v4504_v43, %v3518_v11  ;;  %v2290_v34 = vadd.f32 %v4504_v43, %v3646_v12  ;;  %v2619_v36 = vmax.f32 %v2287_v21, 0.0 }
 0x1a9   :  { %v2489_v22 = vmax.f32 %v1767_v9, 0.0  ;;  %v2617_v23 = vmax.f32 %v2279_v10, 0.0  ;;  %v2748_v25 = vadd.f32 %v2747_v14, %v2488_v13  ;;  %v2872_v26 = vadd.f32 %v2871_v15, %v2616_v16 }
 0x1aa   :  { %v2943_v27 = vadd.f32 %v2942_v20, %v2941_v8  ;;  %v1770_v28 = vadd.f32 %v4504_v43, %v1769_v18  ;;  %v2282_v29 = vadd.f32 %v4504_v43, %v2281_v19  ;;  %v2491_v41 = vmax.f32 %v1775_v24, 0.0 }
 0x1ab   :  { %v2749_v30 = vadd.f32 %v2748_v25, %v2489_v22  ;;  %v2873_v32 = vadd.f32 %v2872_v26, %v2617_v23  ;;  %v2492_v53 = vmax.f32 %v1778_v33, 0.0  ;;  %v2620_v54 = vmax.f32 %v2290_v34, 0.0 }
 0x1ac   :  { %v2944_v35 = vrot.slane %v2943_v27, 1  ;;  %v2490_v37 = vmax.f32 %v1770_v28, 0.0  ;;  %v2618_v38 = vmax.f32 %v2282_v29, 0.0 }
 0x1ad   :  { %v3521_v39 = vpop.f32.mrb[104].mxu0  ;;  %v3649_v40 = vpop.f32.mrb[104].mxu1 }
 0x1ae   :  { %v1782_v42 = vpop.f32.mrb[105].mxu0  ;;  %v2294_v44 = vpop.f32.mrb[105].mxu1  ;;  %v2945_v45 = vadd.f32 %v2944_v35, %v2943_v27  ;;  %v2750_v46 = vadd.f32 %v2749_v30, %v2490_v37  ;;  %v2874_v47 = vadd.f32 %v2873_v32, %v2618_v38  ;;  %v2303_v55 = vadd.f32 %v4504_v43, %v3649_v40 }
 0x1af   :  { %v1783_v49 = vadd.f32 %v4504_v43, %v1782_v42  ;;  %v3522_v51 = vpop.f32.mrb[106].mxu0  ;;  %v3650_v52 = vpop.f32.mrb[106].mxu1  ;;  %v2295_v48 = vadd.f32 %v4504_v43, %v2294_v44  ;;  %v1791_v63 = vadd.f32 %v4504_v43, %v3521_v39 }
 0x1b0   :  { %v1785_v56 = vpop.f32.mrb[107].mxu0  ;;  %v2297_v58 = vpop.f32.mrb[107].mxu1  ;;  %v2978_v59 = vmul.f32 0.00390625, %v2945_v45  ;;  %v2751_v60 = vadd.f32 %v2750_v46, %v2491_v41  ;;  %v2875_v61 = vadd.f32 %v2874_v47, %v2619_v36  ;;  %v1794_v5 = vadd.f32 %v4504_v43, %v3522_v51 }
 0x1b1   :  { %v2493_v62 = vmax.f32 %v1783_v49, 0.0  ;;  %v2621_v0 = vmax.f32 %v2295_v48, 0.0  ;;  %v1786_v1 = vadd.f32 %v4504_v43, %v1785_v56  ;;  %v2298_v4 = vadd.f32 %v4504_v43, %v2297_v58 }
 0x1b2   :  { %v2752_v2 = vadd.f32 %v2751_v60, %v2492_v53  ;;  %v2876_v3 = vadd.f32 %v2875_v61, %v2620_v54  ;;  %v2306_v6 = vadd.f32 %v4504_v43, %v3650_v52  ;;  %v4612_v8 = vsel %vm2994_vm2, %v2978_v59, %v4542_v50 }
 0x1b3   :  { %v2494_v7 = vmax.f32 %v1786_v1, 0.0  ;;  %v2623_v9 = vmax.f32 %v2303_v55, 0.0  ;;  %v2622_v12 = vmax.f32 %v2298_v4, 0.0  ;;  %v2495_v14 = vmax.f32 %v1791_v63, 0.0 }
 0x1b4   :  { %v2753_v10 = vadd.f32 %v2752_v2, %v2493_v62  ;;  %v2877_v11 = vadd.f32 %v2876_v3, %v2621_v0  ;;  %v2496_v25 = vmax.f32 %v1794_v5, 0.0  ;;  %v2624_v50 = vmax.f32 %v2306_v6, 0.0 }
 0x1b5   :  { %v3525_v13 = vpop.f32.mrb[108].mxu0  ;;  %v3653_v16 = vpop.f32.mrb[108].mxu1 }
 0x1b6   :  { %v1798_v15 = vpop.f32.mrb[109].mxu0  ;;  %v2310_v18 = vpop.f32.mrb[109].mxu1  ;;  %v2754_v19 = vadd.f32 %v2753_v10, %v2494_v7  ;;  %v2878_v20 = vadd.f32 %v2877_v11, %v2622_v12  ;;  %v2319_v26 = vadd.f32 %v4504_v43, %v3653_v16  ;;  %v1807_v34 = vadd.f32 %v4504_v43, %v3525_v13 }
 0x1b7   :  { %v1799_v21 = vadd.f32 %v4504_v43, %v1798_v15  ;;  %v2311_v22 = vadd.f32 %v4504_v43, %v2310_v18  ;;  %v3526_v23 = vpop.f32.mrb[110].mxu0  ;;  %v3654_v24 = vpop.f32.mrb[110].mxu1 }
 0x1b8   :  { %v1801_v27 = vpop.f32.mrb[111].mxu0  ;;  %v2313_v28 = vpop.f32.mrb[111].mxu1  ;;  %v2755_v29 = vadd.f32 %v2754_v19, %v2495_v14  ;;  %v2879_v30 = vadd.f32 %v2878_v20, %v2623_v9  ;;  %v1810_v39 = vadd.f32 %v4504_v43, %v3526_v23  ;;  %v2322_v40 = vadd.f32 %v4504_v43, %v3654_v24 }
 0x1b9   :  { %v2497_v32 = vmax.f32 %v1799_v21, 0.0  ;;  %v2625_v33 = vmax.f32 %v2311_v22, 0.0  ;;  %v1802_v35 = vadd.f32 %v4504_v43, %v1801_v27  ;;  %v2314_v36 = vadd.f32 %v4504_v43, %v2313_v28 }
 0x1ba   :  { %v2756_v37 = vadd.f32 %v2755_v29, %v2496_v25  ;;  %v2880_v38 = vadd.f32 %v2879_v30, %v2624_v50  ;;  %v2627_v44 = vmax.f32 %v2319_v26, 0.0  ;;  %v2499_v51 = vmax.f32 %v1807_v34, 0.0 }
 0x1bb   :  { %v2498_v41 = vmax.f32 %v1802_v35, 0.0  ;;  %v2626_v42 = vmax.f32 %v2314_v36, 0.0  ;;  %v2500_v60 = vmax.f32 %v1810_v39, 0.0  ;;  %v2628_v61 = vmax.f32 %v2322_v40, 0.0 }
 0x1bc   :  { %v2757_v45 = vadd.f32 %v2756_v37, %v2497_v32  ;;  %v2881_v46 = vadd.f32 %v2880_v38, %v2625_v33 }
 0x1bd   :  { %v3529_v47 = vpop.f32.mrb[112].mxu0  ;;  %v3657_v49 = vpop.f32.mrb[112].mxu1 }
 0x1be   :  { %v1814_v52 = vpop.f32.mrb[113].mxu0  ;;  %v2326_v53 = vpop.f32.mrb[113].mxu1  ;;  %v2758_v54 = vadd.f32 %v2757_v45, %v2498_v41  ;;  %v2882_v55 = vadd.f32 %v2881_v46, %v2626_v42  ;;  %v2335_v62 = vadd.f32 %v4504_v43, %v3657_v49  ;;  %v1823_v7 = vadd.f32 %v4504_v43, %v3529_v47 }
 0x1bf   :  { %v1815_v48 = vadd.f32 %v4504_v43, %v1814_v52  ;;  %v2327_v56 = vadd.f32 %v4504_v43, %v2326_v53  ;;  %v3530_v58 = vpop.f32.mrb[114].mxu0  ;;  %v3658_v59 = vpop.f32.mrb[114].mxu1 }
 0x1c0   :  { %v1817_v63 = vpop.f32.mrb[115].mxu0  ;;  %v2329_v0 = vpop.f32.mrb[115].mxu1  ;;  %v2759_v1 = vadd.f32 %v2758_v54, %v2499_v51  ;;  %v2883_v2 = vadd.f32 %v2882_v55, %v2627_v44  ;;  %v1826_v11 = vadd.f32 %v4504_v43, %v3530_v58  ;;  %v2631_v16 = vmax.f32 %v2335_v62, 0.0 }
 0x1c1   :  { %v2501_v3 = vmax.f32 %v1815_v48, 0.0  ;;  %v2629_v4 = vmax.f32 %v2327_v56, 0.0  ;;  %v1818_v5 = vadd.f32 %v4504_v43, %v1817_v63  ;;  %v2330_v6 = vadd.f32 %v4504_v43, %v2329_v0 }
 0x1c2   :  { %v2760_v9 = vadd.f32 %v2759_v1, %v2500_v60  ;;  %v2884_v10 = vadd.f32 %v2883_v2, %v2628_v61  ;;  %v2338_v18 = vadd.f32 %v4504_v43, %v3658_v59  ;;  %v2503_v22 = vmax.f32 %v1823_v7, 0.0 }
 0x1c3   :  { %v2502_v12 = vmax.f32 %v1818_v5, 0.0  ;;  %v2630_v13 = vmax.f32 %v2330_v6, 0.0  ;;  %v2504_v27 = vmax.f32 %v1826_v11, 0.0  ;;  %v3807_v11 = vld [vmem:[%s4665_s2] ss:$0 sm:$0xff]  ;;  %s3832_s2 = smov [#allocation3]  }
 0x1c4   :  { %v2761_v14 = vadd.f32 %v2760_v9, %v2501_v3  ;;  %v2885_v15 = vadd.f32 %v2884_v10, %v2629_v4  ;;  %v2632_v33 = vmax.f32 %v2338_v18, 0.0  ;;  %s3014_s24 = sshll.u32 %s3832_s2, 4  ;;  %s3015_s24 = int_to_ptr.vmem [resolvable:$true] %s3014_s24 }
 0x1c5   :  { %v3533_v19 = vpop.f32.mrb[116].mxu0  ;;  %v3661_v20 = vpop.f32.mrb[116].mxu1  ;;  %s3808_s25 = scalar_lea.vmem %s3015_s24, 128  ;;  %p3813_p1 = scmp.lt.s32.totalorder %s3015_s24, %s3015_s24 }
 0x1c6   :  { %v1830_v21 = vpop.f32.mrb[117].mxu0  ;;  %v2762_v23 = vadd.f32 %v2761_v14, %v2502_v12  ;;  %v2886_v24 = vadd.f32 %v2885_v15, %v2630_v13  ;;  %v2342_v50 = vpop.f32.mrb[117].mxu1  ;;  %v2351_v28 = vadd.f32 %v4504_v43, %v3661_v20  ;;  %v1839_v40 = vadd.f32 %v4504_v43, %v3533_v19  ;;  %p3809_p0 = scmp.ne.s32.totalorder %s3015_s24, %s3808_s25  ;;  %p3814_p2 = scmp.lt.s32.totalorder %s3808_s25, %s3808_s25 }
 0x1c7   :  { %v1831_v25 = vadd.f32 %v4504_v43, %v1830_v21  ;;  %v3534_v26 = vpop.f32.mrb[118].mxu0  ;;  %v2343_v29 = vadd.f32 %v4504_v43, %v2342_v50  ;;  %v3662_v30 = vpop.f32.mrb[118].mxu1 }
 0x1c8   :  { %v1833_v32 = vpop.f32.mrb[119].mxu0  ;;  %v2763_v34 = vadd.f32 %v2762_v23, %v2503_v22  ;;  %v2887_v35 = vadd.f32 %v2886_v24, %v2631_v16  ;;  %v2345_v37 = vpop.f32.mrb[119].mxu1  ;;  %v2635_v45 = vmax.f32 %v2351_v28, 0.0  ;;  %v1842_v46 = vadd.f32 %v4504_v43, %v3534_v26  ;;  %p3815_p3 = por %p3814_p2, %p3813_p1 }
 0x1c9   :  { %v2505_v36 = vmax.f32 %v1831_v25, 0.0  ;;  %v2633_v38 = vmax.f32 %v2343_v29, 0.0  ;;  %v1834_v39 = vadd.f32 %v4504_v43, %v1833_v32  ;;  %v2346_v44 = vadd.f32 %v4504_v43, %v2345_v37 }
 0x1ca   :  { %v2764_v41 = vadd.f32 %v2763_v34, %v2504_v27  ;;  %v2888_v42 = vadd.f32 %v2887_v35, %v2632_v33  ;;  %v2354_v52 = vadd.f32 %v4504_v43, %v3662_v30  ;;  %v2507_v56 = vmax.f32 %v1839_v40, 0.0  ;;  %p3816_p4 = pnand %p3815_p3, %p3809_p0 }
 0x1cb   :  { %v2506_v47 = vmax.f32 %v1834_v39, 0.0  ;;  %v2634_v53 = vmax.f32 %v2346_v44, 0.0  ;;  %v2508_v63 = vmax.f32 %v1842_v46, 0.0  ;;  %v2952_v44 = vrot.slane %v4446_v17, 4 }
 0x1cc   :  { %v2765_v49 = vadd.f32 %v2764_v41, %v2505_v36  ;;  %v2889_v51 = vadd.f32 %v2888_v42, %v2633_v38  ;;  %v2636_v4 = vmax.f32 %v2354_v52, 0.0 }
 0x1cd   :  { %v3537_v54 = vpop.f32.mrb[120].mxu0  ;;  %v3665_v55 = vpop.f32.mrb[120].mxu1 }
 0x1ce   :  { %v1846_v48 = vpop.f32.mrb[121].mxu0  ;;  %v2766_v58 = vadd.f32 %v2765_v49, %v2506_v47  ;;  %v2890_v59 = vadd.f32 %v2889_v51, %v2634_v53  ;;  %v2358_v61 = vpop.f32.mrb[121].mxu1  ;;  %v2367_v0 = vadd.f32 %v4504_v43, %v3665_v55  ;;  %v1855_v13 = vadd.f32 %v3807_v11, %v3537_v54 }
 0x1cf   :  { %v1847_v60 = vadd.f32 %v4504_v43, %v1846_v48  ;;  %v3538_v62 = vpop.f32.mrb[122].mxu0  ;;  %v2359_v1 = vadd.f32 %v4504_v43, %v2358_v61  ;;  %v3666_v2 = vpop.f32.mrb[122].mxu1  ;;  %v2964_v54 = vrot.slane %v4590_v57, 4 }
 0x1d0   :  { %v1849_v3 = vpop.f32.mrb[123].mxu0  ;;  %v2767_v5 = vadd.f32 %v2766_v58, %v2507_v56  ;;  %v2891_v6 = vadd.f32 %v2890_v59, %v2635_v45  ;;  %v2361_v9 = vpop.f32.mrb[123].mxu1  ;;  %v2639_v18 = vmax.f32 %v2367_v0, 0.0  ;;  %v1858_v19 = vadd.f32 %v3807_v11, %v3538_v62 }
 0x1d1   :  { %v2509_v7 = vmax.f32 %v1847_v60, 0.0  ;;  %v2637_v10 = vmax.f32 %v2359_v1, 0.0  ;;  %v1850_v12 = vadd.f32 %v3807_v11, %v1849_v3  ;;  %v2362_v15 = vadd.f32 %v3807_v11, %v2361_v9 }
 0x1d2   :  { %v2768_v16 = vadd.f32 %v2767_v5, %v2508_v63  ;;  %v2892_v14 = vadd.f32 %v2891_v6, %v2636_v4  ;;  %v2370_v22 = vadd.f32 %v3807_v11, %v3666_v2  ;;  %v2511_v26 = vmax.f32 %v1855_v13, 0.0 }
 0x1d3   :  { %v2510_v43 = vmax.f32 %v1850_v12, 0.0  ;;  %v2638_v23 = vmax.f32 %v2362_v15, 0.0  ;;  %v2512_v33 = vmax.f32 %v1858_v19, 0.0  ;;  %v2958_v45 = vrot.slane %v4521_v31, 4 }
 0x1d4   :  { %v2769_v20 = vadd.f32 %v2768_v16, %v2509_v7  ;;  %v2893_v21 = vadd.f32 %v2892_v14, %v2637_v10  ;;  %v2640_v38 = vmax.f32 %v2370_v22, 0.0  ;;  %v2953_v62 = vadd.f32 %v2952_v44, %v4446_v17 }
 0x1d5   :  { %v3541_v24 = vpop.f32.mrb[124].mxu0  ;;  %v3669_v25 = vpop.f32.mrb[124].mxu1  ;;  %v2959_v63 = vadd.f32 %v2958_v45, %v4521_v31  ;;  %v2965_v3 = vadd.f32 %v2964_v54, %v4590_v57 }
 0x1d6   :  { %v1862_v50 = vpop.f32.mrb[125].mxu0  ;;  %v2770_v27 = vadd.f32 %v2769_v20, %v2510_v43  ;;  %v2894_v28 = vadd.f32 %v2893_v21, %v2638_v23  ;;  %v2374_v30 = vpop.f32.mrb[125].mxu1  ;;  %v2383_v34 = vadd.f32 %v3807_v11, %v3669_v25  ;;  %v1871_v49 = vadd.f32 %v3807_v11, %v3541_v24 }
 0x1d7   :  { %v1863_v29 = vadd.f32 %v3807_v11, %v1862_v50  ;;  %v3542_v32 = vpop.f32.mrb[126].mxu0  ;;  %v2375_v35 = vadd.f32 %v3807_v11, %v2374_v30  ;;  %v3670_v36 = vpop.f32.mrb[126].mxu1  ;;  %v2954_v9 = vrot.slane %v2953_v62, 2  ;;  %v2960_v10 = vrot.slane %v2959_v63, 2 }
 0x1d8   :  { %v1865_v37 = vpop.f32.mrb[127].mxu0  ;;  %v2771_v39 = vadd.f32 %v2770_v27, %v2511_v26  ;;  %v2895_v40 = vadd.f32 %v2894_v28, %v2639_v18  ;;  %v2377_v42 = vpop.f32.mrb[127].mxu1  ;;  %v2643_v55 = vmax.f32 %v2383_v34, 0.0  ;;  %v1874_v48 = vadd.f32 %v3807_v11, %v3542_v32 }
 0x1d9   :  { %v2513_v41 = vmax.f32 %v1863_v29, 0.0  ;;  %v2641_v46 = vmax.f32 %v2375_v35, 0.0  ;;  %v1866_v47 = vadd.f32 %v3807_v11, %v1865_v37  ;;  %v2378_v53 = vadd.f32 %v3807_v11, %v2377_v42 }
 0x1da   :  { %v2772_v51 = vadd.f32 %v2771_v39, %v2512_v33  ;;  %v2896_v52 = vadd.f32 %v2895_v40, %v2640_v38  ;;  %v2386_v60 = vadd.f32 %v3807_v11, %v3670_v36  ;;  %v2515_v0 = vmax.f32 %v1871_v49, 0.0 }
 0x1db   :  { %v2514_v56 = vmax.f32 %v1866_v47, 0.0  ;;  %v2642_v61 = vmax.f32 %v2378_v53, 0.0  ;;  %v2516_v4 = vmax.f32 %v1874_v48, 0.0  ;;  %v2966_v16 = vrot.slane %v2965_v3, 2 }
 0x1dc   :  { %v2773_v58 = vadd.f32 %v2772_v51, %v2513_v41  ;;  %v2897_v59 = vadd.f32 %v2896_v52, %v2641_v46  ;;  %v2644_v5 = vmax.f32 %v2386_v60, 0.0  ;;  %v2955_v15 = vadd.f32 %v2954_v9, %v2953_v62 }
 0x1dd   :  { %v2961_v17 = vadd.f32 %v2960_v10, %v2959_v63  ;;  %v2967_v19 = vadd.f32 %v2966_v16, %v2965_v3 }
 0x1de   :  { %v2774_v1 = vadd.f32 %v2773_v58, %v2514_v56  ;;  %v2898_v2 = vadd.f32 %v2897_v59, %v2642_v61  ;;  %v2956_v21 = vrot.slane %v2955_v15, 1 }
 0x1df   :  { %v2962_v57 = vrot.slane %v2961_v17, 1  ;;  %v2968_v24 = vrot.slane %v2967_v19, 1 }
 0x1e0   :  { %v2775_v6 = vadd.f32 %v2774_v1, %v2515_v0  ;;  %v2899_v7 = vadd.f32 %v2898_v2, %v2643_v55  ;;  %v2957_v26 = vadd.f32 %v2956_v21, %v2955_v15 }
 0x1e1   :  { %v2963_v28 = vadd.f32 %v2962_v57, %v2961_v17  ;;  %v2969_v29 = vadd.f32 %v2968_v24, %v2967_v19 }
 0x1e2   :  { %v2776_v12 = vadd.f32 %v2775_v6, %v2516_v4  ;;  %v2900_v13 = vadd.f32 %v2899_v7, %v2644_v5  ;;  %v2980_v33 = vmul.f32 0.00390625, %v2957_v26 }
 0x1e3   :  { %v2981_v34 = vmul.f32 0.00390625, %v2963_v28  ;;  %v2982_v36 = vmul.f32 0.00390625, %v2969_v29 }
 0x1e4   :  { %v2946_v11 = vrot.slane %v2776_v12, 4  ;;  %v2970_v14 = vrot.slane %v2900_v13, 4 }
 0x1e6   :  { %v2947_v18 = vadd.f32 %v2946_v11, %v2776_v12  ;;  %v2971_v31 = vadd.f32 %v2970_v14, %v2900_v13 }
 0x1e8   :  { %v2948_v43 = vrot.slane %v2947_v18, 2  ;;  %v2972_v20 = vrot.slane %v2971_v31, 2 }
 0x1ea   :  { %v2949_v22 = vadd.f32 %v2948_v43, %v2947_v18  ;;  %v2973_v23 = vadd.f32 %v2972_v20, %v2971_v31 }
 0x1ec   :  { %v2950_v25 = vrot.slane %v2949_v22, 1  ;;  %v2974_v50 = vrot.slane %v2973_v23, 1 }
 0x1ee   :  { %v2951_v27 = vadd.f32 %v2950_v25, %v2949_v22  ;;  %v2975_v32 = vadd.f32 %v2974_v50, %v2973_v23 }
 0x1f0   :  { %v2979_v30 = vmul.f32 0.00390625, %v2951_v27  ;;  %v2983_v38 = vmul.f32 0.00390625, %v2975_v32 }
 0x1f2   :  { %v2997_v35 = vsel %vm2996_vm3, %v2979_v30, %v4612_v8 }
 0x1f3   :  { %v2999_v37 = vsel %vm2998_vm4, %v2980_v33, %v2997_v35 }
 0x1f4   :  { %v3001_v39 = vsel %vm3000_vm5, %v2981_v34, %v2999_v37 }
 0x1f5   :  { %v3003_v40 = vsel %vm3002_vm6, %v2982_v36, %v3001_v39 }
 0x1f6   :  { %v3005_v41 = vsel %vm3004_vm7, %v2983_v38, %v3003_v40 }
 0x1f7   :  { %3007 = vst [vmem:[#allocation3] sm:$0xff] %v3005_v41 }
 0x1f8   :  { %3819 = shalt.err (!%p3816_p4)
}
 0x1f9   :  { %s3820_s28 = scalar_lea.hbm %s4666_s3, 128 }
 0x1fa   :  { %p3821_p5 = scmp.ne.s32.totalorder %s4666_s3, %s3820_s28  ;;  %p3824_p6 = scmp.lt.u32.totalorder %s3820_s28, %s4666_s3 }
 0x1fc   :  { %p3826_p7 = pnand %p3824_p6, %p3821_p5 }
 0x1fe   :  { %3829 = shalt.err (!%p3826_p7)
}
 0x1ff   :  { %3017 = dma.vmem_to_hbm [thread:$0]  %s3015_s24, 128, %s4666_s3, [#allocation4]  }
 0x200   :  { %3830 = dma.done.wait [#allocation4], 128  }
 0x201   :  { %3831 = vsyncadd [#allocation4], 4294967168 }
 0x202   :  { %3021 = vsyncpa [#allocation4], 1 }

</bundles_post_ra>
